<compile_context>
chip_gen: v6e
topology: v6e:2x2x1
jax: 0.10.0
libtpu: 0.0.40
codegen_flags: <defaults>
</compile_context>

<pallas_src>
import math
from functools import partial

import jax
import jax.numpy as jnp
from jax.experimental import pallas as pl
from jax.experimental.pallas import tpu as pltpu


# ----------------------------------------------------------------------------
# Fused kernel factory. num_layers / hidden_size / seq_len / batch are static.
# Gate order (after repack) is (i, f, o, g); PyTorch's is (i, f, g, o).
# ----------------------------------------------------------------------------
def _make_fused_kernel(num_layers, hidden_size, seq_len, batch_pad):
    H = hidden_size
    L = num_layers
    T = seq_len
    B = batch_pad

    def kernel(x_ref, *refs):
        # refs = (wx_0, wh_0, b_0, ..., wx_{L-1}, wh_{L-1}, b_{L-1},
        #         w_fc, b_fc, o_ref, xp_scratch)
        wfc_ref = refs[3 * L]
        bfc_ref = refs[3 * L + 1]
        o_ref = refs[3 * L + 2]
        xp_ref = refs[3 * L + 3]

        # ---- Hoisted layer-0 input projection: one MXU matmul for all T
        # steps, bias folded in (single broadcast).  Result lives in VMEM
        # scratch; per-step reads below are cheap aligned vlds (bounds live
        # ranges instead of pinning 8 vregs across the whole recurrence).
        x_bf = x_ref[...].astype(jnp.bfloat16)                    # (T*B, D)
        xp_ref[...] = (
            jnp.dot(x_bf, refs[0][...], preferred_element_type=jnp.float32)
            + refs[2][...]
        )                                                         # (T*B, 4H)

        # ---- Biases for layers >= 1: broadcast ONCE, not once per step.
        b_bc = [jnp.broadcast_to(refs[3 * l + 2][...], (B, 4 * H))
                for l in range(1, L)]

        hs = [jnp.zeros((B, H), jnp.float32) for _ in range(L)]
        cs = [jnp.zeros((B, H), jnp.float32) for _ in range(L)]

        def cell(g, l):
            # Repacked gate order (i, f, o, g): one sigmoid over the 3H
            # contiguous sigmoid lanes, one tanh over the last H lanes.
            sig = jax.nn.sigmoid(g[:, : 3 * H])
            g_g = jnp.tanh(g[:, 3 * H:])
            i_g = sig[:, :H]
            f_g = sig[:, H: 2 * H]
            o_g = sig[:, 2 * H: 3 * H]
            cs[l] = f_g * cs[l] + i_g * g_g
            hs[l] = o_g * jnp.tanh(cs[l])

        # ---- Fully unrolled recurrence (T, L small & static) so MXU pushes
        # of step t+1 overlap EUP/VALU of step t.
        for t in range(T):
            # Layer 0: only the recurrent matmul is on the dependent path.
            g0 = xp_ref[pl.ds(t * B, B), :] + jnp.dot(
                hs[0].astype(jnp.bfloat16), refs[1][...],
                preferred_element_type=jnp.float32)
            cell(g0, 0)
            # Layers >= 1: two independent MXU pushes (no lane concat).
            for l in range(1, L):
                g = (jnp.dot(hs[l - 1].astype(jnp.bfloat16), refs[3 * l][...],
                             preferred_element_type=jnp.float32)
                     + jnp.dot(hs[l].astype(jnp.bfloat16), refs[3 * l + 1][...],
                               preferred_element_type=jnp.float32)
                     + b_bc[l - 1])
                cell(g, l)

        # ---- Lane-dense FC head: (B, H) @ (H, 128) + b -> full-vreg store.
        out = (jnp.dot(hs[-1].astype(jnp.bfloat16), wfc_ref[...],
                       preferred_element_type=jnp.float32)
               + bfc_ref[...])
        o_ref[...] = out.astype(o_ref.dtype)

    return kernel


# ----------------------------------------------------------------------------
# Wrapper: single gridless pallas_call, everything resident in VMEM.
# ----------------------------------------------------------------------------
@partial(jax.jit, static_argnames=("output_size",))
def stock_price_predictor(x, params, *, output_size):
    # x: (B, T, input_size), batch_first like PyTorch.
    B, T, D = x.shape
    L = len(params["lstm"])
    H = params["lstm"][0]["wh"].shape[0]
    O_pad = params["fc"]["w"].shape[1]

    # Pad batch to a full sublane group (8) so loads/stores/MXU LHS are
    # unmasked.  Padded rows run harmless math on zeros and are sliced off.
    B_pad = int(pl.cdiv(B, 8) * 8)
    xf = x.astype(jnp.float32)
    if B_pad != B:
        xf = jnp.pad(xf, ((0, B_pad - B), (0, 0), (0, 0)))
    # Time-major & flattened: step t occupies rows [t*B_pad, (t+1)*B_pad).
    x2d = jnp.transpose(xf, (1, 0, 2)).reshape(T * B_pad, D)

    args = [x2d]
    in_specs = [pl.BlockSpec((T * B_pad, D), lambda: (0, 0))]
    for lp in params["lstm"]:
        args += [lp["wx"], lp["wh"], lp["b"]]
        in_specs += [
            pl.BlockSpec(lp["wx"].shape, lambda: (0, 0)),
            pl.BlockSpec(lp["wh"].shape, lambda: (0, 0)),
            pl.BlockSpec(lp["b"].shape, lambda: (0, 0)),
        ]
    args += [params["fc"]["w"], params["fc"]["b"]]
    in_specs += [
        pl.BlockSpec(params["fc"]["w"].shape, lambda: (0, 0)),
        pl.BlockSpec(params["fc"]["b"].shape, lambda: (0, 0)),
    ]

    out = pl.pallas_call(
        _make_fused_kernel(L, H, T, B_pad),
        out_shape=jax.ShapeDtypeStruct((B_pad, O_pad), jnp.float32),
        in_specs=in_specs,
        out_specs=pl.BlockSpec((B_pad, O_pad), lambda: (0, 0)),
        scratch_shapes=[pltpu.VMEM((T * B_pad, 4 * H), jnp.float32)],
    )(*args)
    return out[:B, :output_size]


# ----------------------------------------------------------------------------
# Parameter init (mirrors PyTorch nn.LSTM/nn.Linear shapes & init range).
# Packing for the kernel:
#   * gate columns reordered (i, f, g, o) -> (i, f, o, g)
#   * wx = W_ih^T (D_in, 4H) bf16, wh = W_hh^T (H, 4H) bf16 (MXU operands)
#   * b  = b_ih + b_hh (1, 4H) f32
#   * FC weight zero-padded to (H, 128) bf16 for a lane-dense output store.
# ----------------------------------------------------------------------------
def init_params(key, input_size, hidden_size, num_layers, output_size):
    H = hidden_size
    bound = 1.0 / math.sqrt(H)
    perm = jnp.concatenate([
        jnp.arange(0, H),          # i
        jnp.arange(H, 2 * H),      # f
        jnp.arange(3 * H, 4 * H),  # o
        jnp.arange(2 * H, 3 * H),  # g
    ])
    layers = []
    for layer in range(num_layers):
        d_in = input_size if layer == 0 else H
        key, k1, k2, k3, k4 = jax.random.split(key, 5)
        w_ih = jax.random.uniform(k1, (4 * H, d_in), jnp.float32, -bound, bound)
        w_hh = jax.random.uniform(k2, (4 * H, H), jnp.float32, -bound, bound)
        b_ih = jax.random.uniform(k3, (4 * H,), jnp.float32, -bound, bound)
        b_hh = jax.random.uniform(k4, (4 * H,), jnp.float32, -bound, bound)
        layers.append(dict(
            wx=w_ih[perm].T.astype(jnp.bfloat16),        # (d_in, 4H)
            wh=w_hh[perm].T.astype(jnp.bfloat16),        # (H, 4H)
            b=(b_ih + b_hh)[perm].reshape(1, -1),        # (1, 4H) f32
        ))
    key, k1, k2 = jax.random.split(key, 3)
    w_fc = jax.random.uniform(k1, (output_size, H), jnp.float32, -bound, bound)
    b_fc = jax.random.uniform(k2, (output_size,), jnp.float32, -bound, bound)
    O_pad = 128
    w_fc_pad = jnp.zeros((H, O_pad), jnp.float32).at[:, :output_size].set(w_fc.T)
    b_fc_pad = jnp.zeros((1, O_pad), jnp.float32).at[:, :output_size].set(
        b_fc.reshape(1, -1))
    fc = dict(w=w_fc_pad.astype(jnp.bfloat16), b=b_fc_pad)
    return dict(lstm=layers, fc=fc)


# ----------------------------------------------------------------------------
# Pure-JAX references.  bf16_matmul=True mirrors the kernel's MXU precision
# (apples-to-apples, tight tolerance); bf16_matmul=False is the f32-highest
# baseline used as a looser sanity envelope for the bf16 operand cast.
# ----------------------------------------------------------------------------
def reference_forward(x, params, output_size, *, bf16_matmul):
    def mm(a, b):
        if bf16_matmul:
            return jnp.dot(a.astype(jnp.bfloat16), b.astype(jnp.bfloat16),
                           preferred_element_type=jnp.float32)
        return jnp.dot(a, b, precision="highest")

    H = params["lstm"][0]["wh"].shape[0]
    seq = jnp.transpose(x, (1, 0, 2)).astype(jnp.float32)       # (T, B, D)
    for lp in params["lstm"]:
        wx = lp["wx"].astype(jnp.float32)
        wh = lp["wh"].astype(jnp.float32)
        b = lp["b"]
        T, B, _ = seq.shape
        h = jnp.zeros((B, H), jnp.float32)
        c = jnp.zeros((B, H), jnp.float32)
        outs = []
        for t in range(T):
            g = mm(seq[t], wx) + mm(h, wh) + b
            sig = jax.nn.sigmoid(g[:, :3 * H])
            i, f, o = sig[:, :H], sig[:, H:2 * H], sig[:, 2 * H:3 * H]
            gg = jnp.tanh(g[:, 3 * H:])
            c = f * c + i * gg
            h = o * jnp.tanh(c)
            outs.append(h)
        seq = jnp.stack(outs, axis=0)
    out = mm(seq[-1], params["fc"]["w"].astype(jnp.float32)) + params["fc"]["b"]
    return out[:, :output_size]


if __name__ == "__main__":
    # Small shapes consistent with the module: batch=2, seq=8, features=4,
    # hidden=32, 2 LSTM layers, output=1.
    B, T, INPUT, HIDDEN, LAYERS, OUTPUT = 2, 8, 4, 32, 2, 1

    key = jax.random.PRNGKey(0)
    key, kx = jax.random.split(key)
    x = jax.random.normal(kx, (B, T, INPUT), jnp.float32)

    params = init_params(key, INPUT, HIDDEN, LAYERS, OUTPUT)

    out = stock_price_predictor(x, params, output_size=OUTPUT)
    out = jax.block_until_ready(out)
    assert out.shape == (B, OUTPUT), out.shape

    # Tight check vs. a reference with matching bf16 MXU operand precision.
    ref_bf16 = reference_forward(x, params, OUTPUT, bf16_matmul=True)
    assert jnp.allclose(out, ref_bf16, atol=1e-3, rtol=1e-3), (out, ref_bf16)

    # Looser envelope vs. the f32-highest baseline (bf16 operand quantization).
    ref_f32 = reference_forward(x, params, OUTPUT, bf16_matmul=False)
    assert jnp.allclose(out, ref_f32, atol=2e-2, rtol=2e-2), (out, ref_f32)

    print("KERNEL_OK")
</pallas_src>

<mosaic_0001>
module attributes {stable_mosaic.version = 11 : i64} {
  func.func @kernel(%arg0: memref<64x4xf32, #tpu.memory_space<vmem>>, %arg1: memref<4x128xbf16, #tpu.memory_space<vmem>>, %arg2: memref<32x128xbf16, #tpu.memory_space<vmem>>, %arg3: memref<1x128xf32, #tpu.memory_space<vmem>>, %arg4: memref<32x128xbf16, #tpu.memory_space<vmem>>, %arg5: memref<32x128xbf16, #tpu.memory_space<vmem>>, %arg6: memref<1x128xf32, #tpu.memory_space<vmem>>, %arg7: memref<32x128xbf16, #tpu.memory_space<vmem>>, %arg8: memref<1x128xf32, #tpu.memory_space<vmem>>, %arg9: memref<8x128xf32, #tpu.memory_space<vmem>>, %arg10: memref<64x128xf32, #tpu.memory_space<vmem>>) attributes {dimension_semantics = [], scalar_prefetch = 0 : i64, scratch_operands = 1 : i64, tpu.core_type = #tpu.core_type<tc>} {
    %c0 = arith.constant 0 : index
    %c0_0 = arith.constant 0 : index
    %0 = vector.load %arg0[%c0, %c0_0] : memref<64x4xf32, #tpu.memory_space<vmem>>, vector<64x4xf32>
    %1 = arith.truncf %0 : vector<64x4xf32> to vector<64x4xbf16>
    %c0_1 = arith.constant 0 : index
    %c0_2 = arith.constant 0 : index
    %2 = vector.load %arg1[%c0_1, %c0_2] : memref<4x128xbf16, #tpu.memory_space<vmem>>, vector<4x128xbf16>
    %cst = arith.constant dense<0.000000e+00> : vector<64x128xf32>
    %3 = tpu.matmul %1, %2, %cst {dimension_numbers = #tpu.dot_dimension_numbers<[1], [0], [0], [1], [0, 0, 1, 1], [], []>} : vector<64x4xbf16>, vector<4x128xbf16>, vector<64x128xf32> -> vector<64x128xf32>
    %c0_3 = arith.constant 0 : index
    %c0_4 = arith.constant 0 : index
    %4 = vector.load %arg3[%c0_3, %c0_4] : memref<1x128xf32, #tpu.memory_space<vmem>>, vector<1x128xf32>
    %5 = vector.broadcast %4 : vector<1x128xf32> to vector<64x128xf32>
    %6 = arith.addf %3, %5 : vector<64x128xf32>
    %c0_5 = arith.constant 0 : index
    %c0_6 = arith.constant 0 : index
    %7 = vector.load %arg10[%c0_5, %c0_6] : memref<64x128xf32, #tpu.memory_space<vmem>>, vector<64x128xf32>
    tpu.vector_store %arg10[%c0_5, %c0_6], %6 {strides = array<i32>} : memref<64x128xf32, #tpu.memory_space<vmem>>, vector<64x128xf32>,
    %c0_7 = arith.constant 0 : index
    %c0_8 = arith.constant 0 : index
    %8 = vector.load %arg6[%c0_7, %c0_8] : memref<1x128xf32, #tpu.memory_space<vmem>>, vector<1x128xf32>
    %9 = vector.shape_cast %8 : vector<1x128xf32> to vector<1x128xf32>
    %10 = vector.broadcast %9 : vector<1x128xf32> to vector<8x128xf32>
    %cst_9 = arith.constant 0.000000e+00 : f32
    %11 = vector.broadcast %cst_9 : f32 to vector<8x32xf32>
    %cst_10 = arith.constant 0.000000e+00 : f32
    %12 = vector.broadcast %cst_10 : f32 to vector<8x32xf32>
    %cst_11 = arith.constant 0.000000e+00 : f32
    %13 = vector.broadcast %cst_11 : f32 to vector<8x32xf32>
    %cst_12 = arith.constant 0.000000e+00 : f32
    %14 = vector.broadcast %cst_12 : f32 to vector<8x32xf32>
    %c0_13 = arith.constant 0 : index
    %c0_14 = arith.constant 0 : index
    %15 = vector.load %arg10[%c0_13, %c0_14] : memref<64x128xf32, #tpu.memory_space<vmem>>, vector<8x128xf32>
    %16 = arith.truncf %11 : vector<8x32xf32> to vector<8x32xbf16>
    %c0_15 = arith.constant 0 : index
    %c0_16 = arith.constant 0 : index
    %17 = vector.load %arg2[%c0_15, %c0_16] : memref<32x128xbf16, #tpu.memory_space<vmem>>, vector<32x128xbf16>
    %cst_17 = arith.constant dense<0.000000e+00> : vector<8x128xf32>
    %18 = tpu.matmul %16, %17, %cst_17 {dimension_numbers = #tpu.dot_dimension_numbers<[1], [0], [0], [1], [0, 0, 1, 1], [], []>} : vector<8x32xbf16>, vector<32x128xbf16>, vector<8x128xf32> -> vector<8x128xf32>
    %19 = arith.addf %15, %18 : vector<8x128xf32>
    %20 = vector.extract_strided_slice %19 {offsets = [0, 0], sizes = [8, 96], strides = [1, 1]} : vector<8x128xf32> to vector<8x96xf32>
    %21 = arith.negf %20 : vector<8x96xf32>
    %22 = math.exp %21 : vector<8x96xf32>
    %cst_18 = arith.constant 1.000000e+00 : f32
    %23 = vector.broadcast %cst_18 : f32 to vector<8x96xf32>
    %24 = arith.addf %23, %22 : vector<8x96xf32>
    %25 = arith.divf %23, %24 : vector<8x96xf32>
    %26 = vector.extract_strided_slice %19 {offsets = [0, 96], sizes = [8, 32], strides = [1, 1]} : vector<8x128xf32> to vector<8x32xf32>
    %27 = math.tanh %26 : vector<8x32xf32>
    %28 = vector.extract_strided_slice %25 {offsets = [0, 0], sizes = [8, 32], strides = [1, 1]} : vector<8x96xf32> to vector<8x32xf32>
    %29 = vector.extract_strided_slice %25 {offsets = [0, 32], sizes = [8, 32], strides = [1, 1]} : vector<8x96xf32> to vector<8x32xf32>
    %30 = vector.extract_strided_slice %25 {offsets = [0, 64], sizes = [8, 32], strides = [1, 1]} : vector<8x96xf32> to vector<8x32xf32>
    %31 = arith.mulf %29, %13 : vector<8x32xf32>
    %32 = arith.mulf %28, %27 : vector<8x32xf32>
    %33 = arith.addf %31, %32 : vector<8x32xf32>
    %34 = math.tanh %33 : vector<8x32xf32>
    %35 = arith.mulf %30, %34 : vector<8x32xf32>
    %36 = arith.truncf %35 : vector<8x32xf32> to vector<8x32xbf16>
    %c0_19 = arith.constant 0 : index
    %c0_20 = arith.constant 0 : index
    %37 = vector.load %arg4[%c0_19, %c0_20] : memref<32x128xbf16, #tpu.memory_space<vmem>>, vector<32x128xbf16>
    %cst_21 = arith.constant dense<0.000000e+00> : vector<8x128xf32>
    %38 = tpu.matmul %36, %37, %cst_21 {dimension_numbers = #tpu.dot_dimension_numbers<[1], [0], [0], [1], [0, 0, 1, 1], [], []>} : vector<8x32xbf16>, vector<32x128xbf16>, vector<8x128xf32> -> vector<8x128xf32>
    %39 = arith.truncf %12 : vector<8x32xf32> to vector<8x32xbf16>
    %c0_22 = arith.constant 0 : index
    %c0_23 = arith.constant 0 : index
    %40 = vector.load %arg5[%c0_22, %c0_23] : memref<32x128xbf16, #tpu.memory_space<vmem>>, vector<32x128xbf16>
    %cst_24 = arith.constant dense<0.000000e+00> : vector<8x128xf32>
    %41 = tpu.matmul %39, %40, %cst_24 {dimension_numbers = #tpu.dot_dimension_numbers<[1], [0], [0], [1], [0, 0, 1, 1], [], []>} : vector<8x32xbf16>, vector<32x128xbf16>, vector<8x128xf32> -> vector<8x128xf32>
    %42 = arith.addf %38, %41 : vector<8x128xf32>
    %43 = arith.addf %42, %10 : vector<8x128xf32>
    %44 = vector.extract_strided_slice %43 {offsets = [0, 0], sizes = [8, 96], strides = [1, 1]} : vector<8x128xf32> to vector<8x96xf32>
    %45 = arith.negf %44 : vector<8x96xf32>
    %46 = math.exp %45 : vector<8x96xf32>
    %cst_25 = arith.constant 1.000000e+00 : f32
    %47 = vector.broadcast %cst_25 : f32 to vector<8x96xf32>
    %48 = arith.addf %47, %46 : vector<8x96xf32>
    %49 = arith.divf %47, %48 : vector<8x96xf32>
    %50 = vector.extract_strided_slice %43 {offsets = [0, 96], sizes = [8, 32], strides = [1, 1]} : vector<8x128xf32> to vector<8x32xf32>
    %51 = math.tanh %50 : vector<8x32xf32>
    %52 = vector.extract_strided_slice %49 {offsets = [0, 0], sizes = [8, 32], strides = [1, 1]} : vector<8x96xf32> to vector<8x32xf32>
    %53 = vector.extract_strided_slice %49 {offsets = [0, 32], sizes = [8, 32], strides = [1, 1]} : vector<8x96xf32> to vector<8x32xf32>
    %54 = vector.extract_strided_slice %49 {offsets = [0, 64], sizes = [8, 32], strides = [1, 1]} : vector<8x96xf32> to vector<8x32xf32>
    %55 = arith.mulf %53, %14 : vector<8x32xf32>
    %56 = arith.mulf %52, %51 : vector<8x32xf32>
    %57 = arith.addf %55, %56 : vector<8x32xf32>
    %58 = math.tanh %57 : vector<8x32xf32>
    %59 = arith.mulf %54, %58 : vector<8x32xf32>
    %c8 = arith.constant 8 : index
    %c0_26 = arith.constant 0 : index
    %60 = vector.load %arg10[%c8, %c0_26] : memref<64x128xf32, #tpu.memory_space<vmem>>, vector<8x128xf32>
    %61 = arith.truncf %35 : vector<8x32xf32> to vector<8x32xbf16>
    %c0_27 = arith.constant 0 : index
    %c0_28 = arith.constant 0 : index
    %62 = vector.load %arg2[%c0_27, %c0_28] : memref<32x128xbf16, #tpu.memory_space<vmem>>, vector<32x128xbf16>
    %cst_29 = arith.constant dense<0.000000e+00> : vector<8x128xf32>
    %63 = tpu.matmul %61, %62, %cst_29 {dimension_numbers = #tpu.dot_dimension_numbers<[1], [0], [0], [1], [0, 0, 1, 1], [], []>} : vector<8x32xbf16>, vector<32x128xbf16>, vector<8x128xf32> -> vector<8x128xf32>
    %64 = arith.addf %60, %63 : vector<8x128xf32>
    %65 = vector.extract_strided_slice %64 {offsets = [0, 0], sizes = [8, 96], strides = [1, 1]} : vector<8x128xf32> to vector<8x96xf32>
    %66 = arith.negf %65 : vector<8x96xf32>
    %67 = math.exp %66 : vector<8x96xf32>
    %cst_30 = arith.constant 1.000000e+00 : f32
    %68 = vector.broadcast %cst_30 : f32 to vector<8x96xf32>
    %69 = arith.addf %68, %67 : vector<8x96xf32>
    %70 = arith.divf %68, %69 : vector<8x96xf32>
    %71 = vector.extract_strided_slice %64 {offsets = [0, 96], sizes = [8, 32], strides = [1, 1]} : vector<8x128xf32> to vector<8x32xf32>
    %72 = math.tanh %71 : vector<8x32xf32>
    %73 = vector.extract_strided_slice %70 {offsets = [0, 0], sizes = [8, 32], strides = [1, 1]} : vector<8x96xf32> to vector<8x32xf32>
    %74 = vector.extract_strided_slice %70 {offsets = [0, 32], sizes = [8, 32], strides = [1, 1]} : vector<8x96xf32> to vector<8x32xf32>
    %75 = vector.extract_strided_slice %70 {offsets = [0, 64], sizes = [8, 32], strides = [1, 1]} : vector<8x96xf32> to vector<8x32xf32>
    %76 = arith.mulf %74, %33 : vector<8x32xf32>
    %77 = arith.mulf %73, %72 : vector<8x32xf32>
    %78 = arith.addf %76, %77 : vector<8x32xf32>
    %79 = math.tanh %78 : vector<8x32xf32>
    %80 = arith.mulf %75, %79 : vector<8x32xf32>
    %81 = arith.truncf %80 : vector<8x32xf32> to vector<8x32xbf16>
    %c0_31 = arith.constant 0 : index
    %c0_32 = arith.constant 0 : index
    %82 = vector.load %arg4[%c0_31, %c0_32] : memref<32x128xbf16, #tpu.memory_space<vmem>>, vector<32x128xbf16>
    %cst_33 = arith.constant dense<0.000000e+00> : vector<8x128xf32>
    %83 = tpu.matmul %81, %82, %cst_33 {dimension_numbers = #tpu.dot_dimension_numbers<[1], [0], [0], [1], [0, 0, 1, 1], [], []>} : vector<8x32xbf16>, vector<32x128xbf16>, vector<8x128xf32> -> vector<8x128xf32>
    %84 = arith.truncf %59 : vector<8x32xf32> to vector<8x32xbf16>
    %c0_34 = arith.constant 0 : index
    %c0_35 = arith.constant 0 : index
    %85 = vector.load %arg5[%c0_34, %c0_35] : memref<32x128xbf16, #tpu.memory_space<vmem>>, vector<32x128xbf16>
    %cst_36 = arith.constant dense<0.000000e+00> : vector<8x128xf32>
    %86 = tpu.matmul %84, %85, %cst_36 {dimension_numbers = #tpu.dot_dimension_numbers<[1], [0], [0], [1], [0, 0, 1, 1], [], []>} : vector<8x32xbf16>, vector<32x128xbf16>, vector<8x128xf32> -> vector<8x128xf32>
    %87 = arith.addf %83, %86 : vector<8x128xf32>
    %88 = arith.addf %87, %10 : vector<8x128xf32>
    %89 = vector.extract_strided_slice %88 {offsets = [0, 0], sizes = [8, 96], strides = [1, 1]} : vector<8x128xf32> to vector<8x96xf32>
    %90 = arith.negf %89 : vector<8x96xf32>
    %91 = math.exp %90 : vector<8x96xf32>
    %cst_37 = arith.constant 1.000000e+00 : f32
    %92 = vector.broadcast %cst_37 : f32 to vector<8x96xf32>
    %93 = arith.addf %92, %91 : vector<8x96xf32>
    %94 = arith.divf %92, %93 : vector<8x96xf32>
    %95 = vector.extract_strided_slice %88 {offsets = [0, 96], sizes = [8, 32], strides = [1, 1]} : vector<8x128xf32> to vector<8x32xf32>
    %96 = math.tanh %95 : vector<8x32xf32>
    %97 = vector.extract_strided_slice %94 {offsets = [0, 0], sizes = [8, 32], strides = [1, 1]} : vector<8x96xf32> to vector<8x32xf32>
    %98 = vector.extract_strided_slice %94 {offsets = [0, 32], sizes = [8, 32], strides = [1, 1]} : vector<8x96xf32> to vector<8x32xf32>
    %99 = vector.extract_strided_slice %94 {offsets = [0, 64], sizes = [8, 32], strides = [1, 1]} : vector<8x96xf32> to vector<8x32xf32>
    %100 = arith.mulf %98, %57 : vector<8x32xf32>
    %101 = arith.mulf %97, %96 : vector<8x32xf32>
    %102 = arith.addf %100, %101 : vector<8x32xf32>
    %103 = math.tanh %102 : vector<8x32xf32>
    %104 = arith.mulf %99, %103 : vector<8x32xf32>
    %c16 = arith.constant 16 : index
    %c0_38 = arith.constant 0 : index
    %105 = vector.load %arg10[%c16, %c0_38] : memref<64x128xf32, #tpu.memory_space<vmem>>, vector<8x128xf32>
    %106 = arith.truncf %80 : vector<8x32xf32> to vector<8x32xbf16>
    %c0_39 = arith.constant 0 : index
    %c0_40 = arith.constant 0 : index
    %107 = vector.load %arg2[%c0_39, %c0_40] : memref<32x128xbf16, #tpu.memory_space<vmem>>, vector<32x128xbf16>
    %cst_41 = arith.constant dense<0.000000e+00> : vector<8x128xf32>
    %108 = tpu.matmul %106, %107, %cst_41 {dimension_numbers = #tpu.dot_dimension_numbers<[1], [0], [0], [1], [0, 0, 1, 1], [], []>} : vector<8x32xbf16>, vector<32x128xbf16>, vector<8x128xf32> -> vector<8x128xf32>
    %109 = arith.addf %105, %108 : vector<8x128xf32>
    %110 = vector.extract_strided_slice %109 {offsets = [0, 0], sizes = [8, 96], strides = [1, 1]} : vector<8x128xf32> to vector<8x96xf32>
    %111 = arith.negf %110 : vector<8x96xf32>
    %112 = math.exp %111 : vector<8x96xf32>
    %cst_42 = arith.constant 1.000000e+00 : f32
    %113 = vector.broadcast %cst_42 : f32 to vector<8x96xf32>
    %114 = arith.addf %113, %112 : vector<8x96xf32>
    %115 = arith.divf %113, %114 : vector<8x96xf32>
    %116 = vector.extract_strided_slice %109 {offsets = [0, 96], sizes = [8, 32], strides = [1, 1]} : vector<8x128xf32> to vector<8x32xf32>
    %117 = math.tanh %116 : vector<8x32xf32>
    %118 = vector.extract_strided_slice %115 {offsets = [0, 0], sizes = [8, 32], strides = [1, 1]} : vector<8x96xf32> to vector<8x32xf32>
    %119 = vector.extract_strided_slice %115 {offsets = [0, 32], sizes = [8, 32], strides = [1, 1]} : vector<8x96xf32> to vector<8x32xf32>
    %120 = vector.extract_strided_slice %115 {offsets = [0, 64], sizes = [8, 32], strides = [1, 1]} : vector<8x96xf32> to vector<8x32xf32>
    %121 = arith.mulf %119, %78 : vector<8x32xf32>
    %122 = arith.mulf %118, %117 : vector<8x32xf32>
    %123 = arith.addf %121, %122 : vector<8x32xf32>
    %124 = math.tanh %123 : vector<8x32xf32>
    %125 = arith.mulf %120, %124 : vector<8x32xf32>
    %126 = arith.truncf %125 : vector<8x32xf32> to vector<8x32xbf16>
    %c0_43 = arith.constant 0 : index
    %c0_44 = arith.constant 0 : index
    %127 = vector.load %arg4[%c0_43, %c0_44] : memref<32x128xbf16, #tpu.memory_space<vmem>>, vector<32x128xbf16>
    %cst_45 = arith.constant dense<0.000000e+00> : vector<8x128xf32>
    %128 = tpu.matmul %126, %127, %cst_45 {dimension_numbers = #tpu.dot_dimension_numbers<[1], [0], [0], [1], [0, 0, 1, 1], [], []>} : vector<8x32xbf16>, vector<32x128xbf16>, vector<8x128xf32> -> vector<8x128xf32>
    %129 = arith.truncf %104 : vector<8x32xf32> to vector<8x32xbf16>
    %c0_46 = arith.constant 0 : index
    %c0_47 = arith.constant 0 : index
    %130 = vector.load %arg5[%c0_46, %c0_47] : memref<32x128xbf16, #tpu.memory_space<vmem>>, vector<32x128xbf16>
    %cst_48 = arith.constant dense<0.000000e+00> : vector<8x128xf32>
    %131 = tpu.matmul %129, %130, %cst_48 {dimension_numbers = #tpu.dot_dimension_numbers<[1], [0], [0], [1], [0, 0, 1, 1], [], []>} : vector<8x32xbf16>, vector<32x128xbf16>, vector<8x128xf32> -> vector<8x128xf32>
    %132 = arith.addf %128, %131 : vector<8x128xf32>
    %133 = arith.addf %132, %10 : vector<8x128xf32>
    %134 = vector.extract_strided_slice %133 {offsets = [0, 0], sizes = [8, 96], strides = [1, 1]} : vector<8x128xf32> to vector<8x96xf32>
    %135 = arith.negf %134 : vector<8x96xf32>
    %136 = math.exp %135 : vector<8x96xf32>
    %cst_49 = arith.constant 1.000000e+00 : f32
    %137 = vector.broadcast %cst_49 : f32 to vector<8x96xf32>
    %138 = arith.addf %137, %136 : vector<8x96xf32>
    %139 = arith.divf %137, %138 : vector<8x96xf32>
    %140 = vector.extract_strided_slice %133 {offsets = [0, 96], sizes = [8, 32], strides = [1, 1]} : vector<8x128xf32> to vector<8x32xf32>
    %141 = math.tanh %140 : vector<8x32xf32>
    %142 = vector.extract_strided_slice %139 {offsets = [0, 0], sizes = [8, 32], strides = [1, 1]} : vector<8x96xf32> to vector<8x32xf32>
    %143 = vector.extract_strided_slice %139 {offsets = [0, 32], sizes = [8, 32], strides = [1, 1]} : vector<8x96xf32> to vector<8x32xf32>
    %144 = vector.extract_strided_slice %139 {offsets = [0, 64], sizes = [8, 32], strides = [1, 1]} : vector<8x96xf32> to vector<8x32xf32>
    %145 = arith.mulf %143, %102 : vector<8x32xf32>
    %146 = arith.mulf %142, %141 : vector<8x32xf32>
    %147 = arith.addf %145, %146 : vector<8x32xf32>
    %148 = math.tanh %147 : vector<8x32xf32>
    %149 = arith.mulf %144, %148 : vector<8x32xf32>
    %c24 = arith.constant 24 : index
    %c0_50 = arith.constant 0 : index
    %150 = vector.load %arg10[%c24, %c0_50] : memref<64x128xf32, #tpu.memory_space<vmem>>, vector<8x128xf32>
    %151 = arith.truncf %125 : vector<8x32xf32> to vector<8x32xbf16>
    %c0_51 = arith.constant 0 : index
    %c0_52 = arith.constant 0 : index
    %152 = vector.load %arg2[%c0_51, %c0_52] : memref<32x128xbf16, #tpu.memory_space<vmem>>, vector<32x128xbf16>
    %cst_53 = arith.constant dense<0.000000e+00> : vector<8x128xf32>
    %153 = tpu.matmul %151, %152, %cst_53 {dimension_numbers = #tpu.dot_dimension_numbers<[1], [0], [0], [1], [0, 0, 1, 1], [], []>} : vector<8x32xbf16>, vector<32x128xbf16>, vector<8x128xf32> -> vector<8x128xf32>
    %154 = arith.addf %150, %153 : vector<8x128xf32>
    %155 = vector.extract_strided_slice %154 {offsets = [0, 0], sizes = [8, 96], strides = [1, 1]} : vector<8x128xf32> to vector<8x96xf32>
    %156 = arith.negf %155 : vector<8x96xf32>
    %157 = math.exp %156 : vector<8x96xf32>
    %cst_54 = arith.constant 1.000000e+00 : f32
    %158 = vector.broadcast %cst_54 : f32 to vector<8x96xf32>
    %159 = arith.addf %158, %157 : vector<8x96xf32>
    %160 = arith.divf %158, %159 : vector<8x96xf32>
    %161 = vector.extract_strided_slice %154 {offsets = [0, 96], sizes = [8, 32], strides = [1, 1]} : vector<8x128xf32> to vector<8x32xf32>
    %162 = math.tanh %161 : vector<8x32xf32>
    %163 = vector.extract_strided_slice %160 {offsets = [0, 0], sizes = [8, 32], strides = [1, 1]} : vector<8x96xf32> to vector<8x32xf32>
    %164 = vector.extract_strided_slice %160 {offsets = [0, 32], sizes = [8, 32], strides = [1, 1]} : vector<8x96xf32> to vector<8x32xf32>
    %165 = vector.extract_strided_slice %160 {offsets = [0, 64], sizes = [8, 32], strides = [1, 1]} : vector<8x96xf32> to vector<8x32xf32>
    %166 = arith.mulf %164, %123 : vector<8x32xf32>
    %167 = arith.mulf %163, %162 : vector<8x32xf32>
    %168 = arith.addf %166, %167 : vector<8x32xf32>
    %169 = math.tanh %168 : vector<8x32xf32>
    %170 = arith.mulf %165, %169 : vector<8x32xf32>
    %171 = arith.truncf %170 : vector<8x32xf32> to vector<8x32xbf16>
    %c0_55 = arith.constant 0 : index
    %c0_56 = arith.constant 0 : index
    %172 = vector.load %arg4[%c0_55, %c0_56] : memref<32x128xbf16, #tpu.memory_space<vmem>>, vector<32x128xbf16>
    %cst_57 = arith.constant dense<0.000000e+00> : vector<8x128xf32>
    %173 = tpu.matmul %171, %172, %cst_57 {dimension_numbers = #tpu.dot_dimension_numbers<[1], [0], [0], [1], [0, 0, 1, 1], [], []>} : vector<8x32xbf16>, vector<32x128xbf16>, vector<8x128xf32> -> vector<8x128xf32>
    %174 = arith.truncf %149 : vector<8x32xf32> to vector<8x32xbf16>
    %c0_58 = arith.constant 0 : index
    %c0_59 = arith.constant 0 : index
    %175 = vector.load %arg5[%c0_58, %c0_59] : memref<32x128xbf16, #tpu.memory_space<vmem>>, vector<32x128xbf16>
    %cst_60 = arith.constant dense<0.000000e+00> : vector<8x128xf32>
    %176 = tpu.matmul %174, %175, %cst_60 {dimension_numbers = #tpu.dot_dimension_numbers<[1], [0], [0], [1], [0, 0, 1, 1], [], []>} : vector<8x32xbf16>, vector<32x128xbf16>, vector<8x128xf32> -> vector<8x128xf32>
    %177 = arith.addf %173, %176 : vector<8x128xf32>
    %178 = arith.addf %177, %10 : vector<8x128xf32>
    %179 = vector.extract_strided_slice %178 {offsets = [0, 0], sizes = [8, 96], strides = [1, 1]} : vector<8x128xf32> to vector<8x96xf32>
    %180 = arith.negf %179 : vector<8x96xf32>
    %181 = math.exp %180 : vector<8x96xf32>
    %cst_61 = arith.constant 1.000000e+00 : f32
    %182 = vector.broadcast %cst_61 : f32 to vector<8x96xf32>
    %183 = arith.addf %182, %181 : vector<8x96xf32>
    %184 = arith.divf %182, %183 : vector<8x96xf32>
    %185 = vector.extract_strided_slice %178 {offsets = [0, 96], sizes = [8, 32], strides = [1, 1]} : vector<8x128xf32> to vector<8x32xf32>
    %186 = math.tanh %185 : vector<8x32xf32>
    %187 = vector.extract_strided_slice %184 {offsets = [0, 0], sizes = [8, 32], strides = [1, 1]} : vector<8x96xf32> to vector<8x32xf32>
    %188 = vector.extract_strided_slice %184 {offsets = [0, 32], sizes = [8, 32], strides = [1, 1]} : vector<8x96xf32> to vector<8x32xf32>
    %189 = vector.extract_strided_slice %184 {offsets = [0, 64], sizes = [8, 32], strides = [1, 1]} : vector<8x96xf32> to vector<8x32xf32>
    %190 = arith.mulf %188, %147 : vector<8x32xf32>
    %191 = arith.mulf %187, %186 : vector<8x32xf32>
    %192 = arith.addf %190, %191 : vector<8x32xf32>
    %193 = math.tanh %192 : vector<8x32xf32>
    %194 = arith.mulf %189, %193 : vector<8x32xf32>
    %c32 = arith.constant 32 : index
    %c0_62 = arith.constant 0 : index
    %195 = vector.load %arg10[%c32, %c0_62] : memref<64x128xf32, #tpu.memory_space<vmem>>, vector<8x128xf32>
    %196 = arith.truncf %170 : vector<8x32xf32> to vector<8x32xbf16>
    %c0_63 = arith.constant 0 : index
    %c0_64 = arith.constant 0 : index
    %197 = vector.load %arg2[%c0_63, %c0_64] : memref<32x128xbf16, #tpu.memory_space<vmem>>, vector<32x128xbf16>
    %cst_65 = arith.constant dense<0.000000e+00> : vector<8x128xf32>
    %198 = tpu.matmul %196, %197, %cst_65 {dimension_numbers = #tpu.dot_dimension_numbers<[1], [0], [0], [1], [0, 0, 1, 1], [], []>} : vector<8x32xbf16>, vector<32x128xbf16>, vector<8x128xf32> -> vector<8x128xf32>
    %199 = arith.addf %195, %198 : vector<8x128xf32>
    %200 = vector.extract_strided_slice %199 {offsets = [0, 0], sizes = [8, 96], strides = [1, 1]} : vector<8x128xf32> to vector<8x96xf32>
    %201 = arith.negf %200 : vector<8x96xf32>
    %202 = math.exp %201 : vector<8x96xf32>
    %cst_66 = arith.constant 1.000000e+00 : f32
    %203 = vector.broadcast %cst_66 : f32 to vector<8x96xf32>
    %204 = arith.addf %203, %202 : vector<8x96xf32>
    %205 = arith.divf %203, %204 : vector<8x96xf32>
    %206 = vector.extract_strided_slice %199 {offsets = [0, 96], sizes = [8, 32], strides = [1, 1]} : vector<8x128xf32> to vector<8x32xf32>
    %207 = math.tanh %206 : vector<8x32xf32>
    %208 = vector.extract_strided_slice %205 {offsets = [0, 0], sizes = [8, 32], strides = [1, 1]} : vector<8x96xf32> to vector<8x32xf32>
    %209 = vector.extract_strided_slice %205 {offsets = [0, 32], sizes = [8, 32], strides = [1, 1]} : vector<8x96xf32> to vector<8x32xf32>
    %210 = vector.extract_strided_slice %205 {offsets = [0, 64], sizes = [8, 32], strides = [1, 1]} : vector<8x96xf32> to vector<8x32xf32>
    %211 = arith.mulf %209, %168 : vector<8x32xf32>
    %212 = arith.mulf %208, %207 : vector<8x32xf32>
    %213 = arith.addf %211, %212 : vector<8x32xf32>
    %214 = math.tanh %213 : vector<8x32xf32>
    %215 = arith.mulf %210, %214 : vector<8x32xf32>
    %216 = arith.truncf %215 : vector<8x32xf32> to vector<8x32xbf16>
    %c0_67 = arith.constant 0 : index
    %c0_68 = arith.constant 0 : index
    %217 = vector.load %arg4[%c0_67, %c0_68] : memref<32x128xbf16, #tpu.memory_space<vmem>>, vector<32x128xbf16>
    %cst_69 = arith.constant dense<0.000000e+00> : vector<8x128xf32>
    %218 = tpu.matmul %216, %217, %cst_69 {dimension_numbers = #tpu.dot_dimension_numbers<[1], [0], [0], [1], [0, 0, 1, 1], [], []>} : vector<8x32xbf16>, vector<32x128xbf16>, vector<8x128xf32> -> vector<8x128xf32>
    %219 = arith.truncf %194 : vector<8x32xf32> to vector<8x32xbf16>
    %c0_70 = arith.constant 0 : index
    %c0_71 = arith.constant 0 : index
    %220 = vector.load %arg5[%c0_70, %c0_71] : memref<32x128xbf16, #tpu.memory_space<vmem>>, vector<32x128xbf16>
    %cst_72 = arith.constant dense<0.000000e+00> : vector<8x128xf32>
    %221 = tpu.matmul %219, %220, %cst_72 {dimension_numbers = #tpu.dot_dimension_numbers<[1], [0], [0], [1], [0, 0, 1, 1], [], []>} : vector<8x32xbf16>, vector<32x128xbf16>, vector<8x128xf32> -> vector<8x128xf32>
    %222 = arith.addf %218, %221 : vector<8x128xf32>
    %223 = arith.addf %222, %10 : vector<8x128xf32>
    %224 = vector.extract_strided_slice %223 {offsets = [0, 0], sizes = [8, 96], strides = [1, 1]} : vector<8x128xf32> to vector<8x96xf32>
    %225 = arith.negf %224 : vector<8x96xf32>
    %226 = math.exp %225 : vector<8x96xf32>
    %cst_73 = arith.constant 1.000000e+00 : f32
    %227 = vector.broadcast %cst_73 : f32 to vector<8x96xf32>
    %228 = arith.addf %227, %226 : vector<8x96xf32>
    %229 = arith.divf %227, %228 : vector<8x96xf32>
    %230 = vector.extract_strided_slice %223 {offsets = [0, 96], sizes = [8, 32], strides = [1, 1]} : vector<8x128xf32> to vector<8x32xf32>
    %231 = math.tanh %230 : vector<8x32xf32>
    %232 = vector.extract_strided_slice %229 {offsets = [0, 0], sizes = [8, 32], strides = [1, 1]} : vector<8x96xf32> to vector<8x32xf32>
    %233 = vector.extract_strided_slice %229 {offsets = [0, 32], sizes = [8, 32], strides = [1, 1]} : vector<8x96xf32> to vector<8x32xf32>
    %234 = vector.extract_strided_slice %229 {offsets = [0, 64], sizes = [8, 32], strides = [1, 1]} : vector<8x96xf32> to vector<8x32xf32>
    %235 = arith.mulf %233, %192 : vector<8x32xf32>
    %236 = arith.mulf %232, %231 : vector<8x32xf32>
    %237 = arith.addf %235, %236 : vector<8x32xf32>
    %238 = math.tanh %237 : vector<8x32xf32>
    %239 = arith.mulf %234, %238 : vector<8x32xf32>
    %c40 = arith.constant 40 : index
    %c0_74 = arith.constant 0 : index
    %240 = vector.load %arg10[%c40, %c0_74] : memref<64x128xf32, #tpu.memory_space<vmem>>, vector<8x128xf32>
    %241 = arith.truncf %215 : vector<8x32xf32> to vector<8x32xbf16>
    %c0_75 = arith.constant 0 : index
    %c0_76 = arith.constant 0 : index
    %242 = vector.load %arg2[%c0_75, %c0_76] : memref<32x128xbf16, #tpu.memory_space<vmem>>, vector<32x128xbf16>
    %cst_77 = arith.constant dense<0.000000e+00> : vector<8x128xf32>
    %243 = tpu.matmul %241, %242, %cst_77 {dimension_numbers = #tpu.dot_dimension_numbers<[1], [0], [0], [1], [0, 0, 1, 1], [], []>} : vector<8x32xbf16>, vector<32x128xbf16>, vector<8x128xf32> -> vector<8x128xf32>
    %244 = arith.addf %240, %243 : vector<8x128xf32>
    %245 = vector.extract_strided_slice %244 {offsets = [0, 0], sizes = [8, 96], strides = [1, 1]} : vector<8x128xf32> to vector<8x96xf32>
    %246 = arith.negf %245 : vector<8x96xf32>
    %247 = math.exp %246 : vector<8x96xf32>
    %cst_78 = arith.constant 1.000000e+00 : f32
    %248 = vector.broadcast %cst_78 : f32 to vector<8x96xf32>
    %249 = arith.addf %248, %247 : vector<8x96xf32>
    %250 = arith.divf %248, %249 : vector<8x96xf32>
    %251 = vector.extract_strided_slice %244 {offsets = [0, 96], sizes = [8, 32], strides = [1, 1]} : vector<8x128xf32> to vector<8x32xf32>
    %252 = math.tanh %251 : vector<8x32xf32>
    %253 = vector.extract_strided_slice %250 {offsets = [0, 0], sizes = [8, 32], strides = [1, 1]} : vector<8x96xf32> to vector<8x32xf32>
    %254 = vector.extract_strided_slice %250 {offsets = [0, 32], sizes = [8, 32], strides = [1, 1]} : vector<8x96xf32> to vector<8x32xf32>
    %255 = vector.extract_strided_slice %250 {offsets = [0, 64], sizes = [8, 32], strides = [1, 1]} : vector<8x96xf32> to vector<8x32xf32>
    %256 = arith.mulf %254, %213 : vector<8x32xf32>
    %257 = arith.mulf %253, %252 : vector<8x32xf32>
    %258 = arith.addf %256, %257 : vector<8x32xf32>
    %259 = math.tanh %258 : vector<8x32xf32>
    %260 = arith.mulf %255, %259 : vector<8x32xf32>
    %261 = arith.truncf %260 : vector<8x32xf32> to vector<8x32xbf16>
    %c0_79 = arith.constant 0 : index
    %c0_80 = arith.constant 0 : index
    %262 = vector.load %arg4[%c0_79, %c0_80] : memref<32x128xbf16, #tpu.memory_space<vmem>>, vector<32x128xbf16>
    %cst_81 = arith.constant dense<0.000000e+00> : vector<8x128xf32>
    %263 = tpu.matmul %261, %262, %cst_81 {dimension_numbers = #tpu.dot_dimension_numbers<[1], [0], [0], [1], [0, 0, 1, 1], [], []>} : vector<8x32xbf16>, vector<32x128xbf16>, vector<8x128xf32> -> vector<8x128xf32>
    %264 = arith.truncf %239 : vector<8x32xf32> to vector<8x32xbf16>
    %c0_82 = arith.constant 0 : index
    %c0_83 = arith.constant 0 : index
    %265 = vector.load %arg5[%c0_82, %c0_83] : memref<32x128xbf16, #tpu.memory_space<vmem>>, vector<32x128xbf16>
    %cst_84 = arith.constant dense<0.000000e+00> : vector<8x128xf32>
    %266 = tpu.matmul %264, %265, %cst_84 {dimension_numbers = #tpu.dot_dimension_numbers<[1], [0], [0], [1], [0, 0, 1, 1], [], []>} : vector<8x32xbf16>, vector<32x128xbf16>, vector<8x128xf32> -> vector<8x128xf32>
    %267 = arith.addf %263, %266 : vector<8x128xf32>
    %268 = arith.addf %267, %10 : vector<8x128xf32>
    %269 = vector.extract_strided_slice %268 {offsets = [0, 0], sizes = [8, 96], strides = [1, 1]} : vector<8x128xf32> to vector<8x96xf32>
    %270 = arith.negf %269 : vector<8x96xf32>
    %271 = math.exp %270 : vector<8x96xf32>
    %cst_85 = arith.constant 1.000000e+00 : f32
    %272 = vector.broadcast %cst_85 : f32 to vector<8x96xf32>
    %273 = arith.addf %272, %271 : vector<8x96xf32>
    %274 = arith.divf %272, %273 : vector<8x96xf32>
    %275 = vector.extract_strided_slice %268 {offsets = [0, 96], sizes = [8, 32], strides = [1, 1]} : vector<8x128xf32> to vector<8x32xf32>
    %276 = math.tanh %275 : vector<8x32xf32>
    %277 = vector.extract_strided_slice %274 {offsets = [0, 0], sizes = [8, 32], strides = [1, 1]} : vector<8x96xf32> to vector<8x32xf32>
    %278 = vector.extract_strided_slice %274 {offsets = [0, 32], sizes = [8, 32], strides = [1, 1]} : vector<8x96xf32> to vector<8x32xf32>
    %279 = vector.extract_strided_slice %274 {offsets = [0, 64], sizes = [8, 32], strides = [1, 1]} : vector<8x96xf32> to vector<8x32xf32>
    %280 = arith.mulf %278, %237 : vector<8x32xf32>
    %281 = arith.mulf %277, %276 : vector<8x32xf32>
    %282 = arith.addf %280, %281 : vector<8x32xf32>
    %283 = math.tanh %282 : vector<8x32xf32>
    %284 = arith.mulf %279, %283 : vector<8x32xf32>
    %c48 = arith.constant 48 : index
    %c0_86 = arith.constant 0 : index
    %285 = vector.load %arg10[%c48, %c0_86] : memref<64x128xf32, #tpu.memory_space<vmem>>, vector<8x128xf32>
    %286 = arith.truncf %260 : vector<8x32xf32> to vector<8x32xbf16>
    %c0_87 = arith.constant 0 : index
    %c0_88 = arith.constant 0 : index
    %287 = vector.load %arg2[%c0_87, %c0_88] : memref<32x128xbf16, #tpu.memory_space<vmem>>, vector<32x128xbf16>
    %cst_89 = arith.constant dense<0.000000e+00> : vector<8x128xf32>
    %288 = tpu.matmul %286, %287, %cst_89 {dimension_numbers = #tpu.dot_dimension_numbers<[1], [0], [0], [1], [0, 0, 1, 1], [], []>} : vector<8x32xbf16>, vector<32x128xbf16>, vector<8x128xf32> -> vector<8x128xf32>
    %289 = arith.addf %285, %288 : vector<8x128xf32>
    %290 = vector.extract_strided_slice %289 {offsets = [0, 0], sizes = [8, 96], strides = [1, 1]} : vector<8x128xf32> to vector<8x96xf32>
    %291 = arith.negf %290 : vector<8x96xf32>
    %292 = math.exp %291 : vector<8x96xf32>
    %cst_90 = arith.constant 1.000000e+00 : f32
    %293 = vector.broadcast %cst_90 : f32 to vector<8x96xf32>
    %294 = arith.addf %293, %292 : vector<8x96xf32>
    %295 = arith.divf %293, %294 : vector<8x96xf32>
    %296 = vector.extract_strided_slice %289 {offsets = [0, 96], sizes = [8, 32], strides = [1, 1]} : vector<8x128xf32> to vector<8x32xf32>
    %297 = math.tanh %296 : vector<8x32xf32>
    %298 = vector.extract_strided_slice %295 {offsets = [0, 0], sizes = [8, 32], strides = [1, 1]} : vector<8x96xf32> to vector<8x32xf32>
    %299 = vector.extract_strided_slice %295 {offsets = [0, 32], sizes = [8, 32], strides = [1, 1]} : vector<8x96xf32> to vector<8x32xf32>
    %300 = vector.extract_strided_slice %295 {offsets = [0, 64], sizes = [8, 32], strides = [1, 1]} : vector<8x96xf32> to vector<8x32xf32>
    %301 = arith.mulf %299, %258 : vector<8x32xf32>
    %302 = arith.mulf %298, %297 : vector<8x32xf32>
    %303 = arith.addf %301, %302 : vector<8x32xf32>
    %304 = math.tanh %303 : vector<8x32xf32>
    %305 = arith.mulf %300, %304 : vector<8x32xf32>
    %306 = arith.truncf %305 : vector<8x32xf32> to vector<8x32xbf16>
    %c0_91 = arith.constant 0 : index
    %c0_92 = arith.constant 0 : index
    %307 = vector.load %arg4[%c0_91, %c0_92] : memref<32x128xbf16, #tpu.memory_space<vmem>>, vector<32x128xbf16>
    %cst_93 = arith.constant dense<0.000000e+00> : vector<8x128xf32>
    %308 = tpu.matmul %306, %307, %cst_93 {dimension_numbers = #tpu.dot_dimension_numbers<[1], [0], [0], [1], [0, 0, 1, 1], [], []>} : vector<8x32xbf16>, vector<32x128xbf16>, vector<8x128xf32> -> vector<8x128xf32>
    %309 = arith.truncf %284 : vector<8x32xf32> to vector<8x32xbf16>
    %c0_94 = arith.constant 0 : index
    %c0_95 = arith.constant 0 : index
    %310 = vector.load %arg5[%c0_94, %c0_95] : memref<32x128xbf16, #tpu.memory_space<vmem>>, vector<32x128xbf16>
    %cst_96 = arith.constant dense<0.000000e+00> : vector<8x128xf32>
    %311 = tpu.matmul %309, %310, %cst_96 {dimension_numbers = #tpu.dot_dimension_numbers<[1], [0], [0], [1], [0, 0, 1, 1], [], []>} : vector<8x32xbf16>, vector<32x128xbf16>, vector<8x128xf32> -> vector<8x128xf32>
    %312 = arith.addf %308, %311 : vector<8x128xf32>
    %313 = arith.addf %312, %10 : vector<8x128xf32>
    %314 = vector.extract_strided_slice %313 {offsets = [0, 0], sizes = [8, 96], strides = [1, 1]} : vector<8x128xf32> to vector<8x96xf32>
    %315 = arith.negf %314 : vector<8x96xf32>
    %316 = math.exp %315 : vector<8x96xf32>
    %cst_97 = arith.constant 1.000000e+00 : f32
    %317 = vector.broadcast %cst_97 : f32 to vector<8x96xf32>
    %318 = arith.addf %317, %316 : vector<8x96xf32>
    %319 = arith.divf %317, %318 : vector<8x96xf32>
    %320 = vector.extract_strided_slice %313 {offsets = [0, 96], sizes = [8, 32], strides = [1, 1]} : vector<8x128xf32> to vector<8x32xf32>
    %321 = math.tanh %320 : vector<8x32xf32>
    %322 = vector.extract_strided_slice %319 {offsets = [0, 0], sizes = [8, 32], strides = [1, 1]} : vector<8x96xf32> to vector<8x32xf32>
    %323 = vector.extract_strided_slice %319 {offsets = [0, 32], sizes = [8, 32], strides = [1, 1]} : vector<8x96xf32> to vector<8x32xf32>
    %324 = vector.extract_strided_slice %319 {offsets = [0, 64], sizes = [8, 32], strides = [1, 1]} : vector<8x96xf32> to vector<8x32xf32>
    %325 = arith.mulf %323, %282 : vector<8x32xf32>
    %326 = arith.mulf %322, %321 : vector<8x32xf32>
    %327 = arith.addf %325, %326 : vector<8x32xf32>
    %328 = math.tanh %327 : vector<8x32xf32>
    %329 = arith.mulf %324, %328 : vector<8x32xf32>
    %c56 = arith.constant 56 : index
    %c0_98 = arith.constant 0 : index
    %330 = vector.load %arg10[%c56, %c0_98] : memref<64x128xf32, #tpu.memory_space<vmem>>, vector<8x128xf32>
    %331 = arith.truncf %305 : vector<8x32xf32> to vector<8x32xbf16>
    %c0_99 = arith.constant 0 : index
    %c0_100 = arith.constant 0 : index
    %332 = vector.load %arg2[%c0_99, %c0_100] : memref<32x128xbf16, #tpu.memory_space<vmem>>, vector<32x128xbf16>
    %cst_101 = arith.constant dense<0.000000e+00> : vector<8x128xf32>
    %333 = tpu.matmul %331, %332, %cst_101 {dimension_numbers = #tpu.dot_dimension_numbers<[1], [0], [0], [1], [0, 0, 1, 1], [], []>} : vector<8x32xbf16>, vector<32x128xbf16>, vector<8x128xf32> -> vector<8x128xf32>
    %334 = arith.addf %330, %333 : vector<8x128xf32>
    %335 = vector.extract_strided_slice %334 {offsets = [0, 0], sizes = [8, 96], strides = [1, 1]} : vector<8x128xf32> to vector<8x96xf32>
    %336 = arith.negf %335 : vector<8x96xf32>
    %337 = math.exp %336 : vector<8x96xf32>
    %cst_102 = arith.constant 1.000000e+00 : f32
    %338 = vector.broadcast %cst_102 : f32 to vector<8x96xf32>
    %339 = arith.addf %338, %337 : vector<8x96xf32>
    %340 = arith.divf %338, %339 : vector<8x96xf32>
    %341 = vector.extract_strided_slice %334 {offsets = [0, 96], sizes = [8, 32], strides = [1, 1]} : vector<8x128xf32> to vector<8x32xf32>
    %342 = math.tanh %341 : vector<8x32xf32>
    %343 = vector.extract_strided_slice %340 {offsets = [0, 0], sizes = [8, 32], strides = [1, 1]} : vector<8x96xf32> to vector<8x32xf32>
    %344 = vector.extract_strided_slice %340 {offsets = [0, 32], sizes = [8, 32], strides = [1, 1]} : vector<8x96xf32> to vector<8x32xf32>
    %345 = vector.extract_strided_slice %340 {offsets = [0, 64], sizes = [8, 32], strides = [1, 1]} : vector<8x96xf32> to vector<8x32xf32>
    %346 = arith.mulf %344, %303 : vector<8x32xf32>
    %347 = arith.mulf %343, %342 : vector<8x32xf32>
    %348 = arith.addf %346, %347 : vector<8x32xf32>
    %349 = math.tanh %348 : vector<8x32xf32>
    %350 = arith.mulf %345, %349 : vector<8x32xf32>
    %351 = arith.truncf %350 : vector<8x32xf32> to vector<8x32xbf16>
    %c0_103 = arith.constant 0 : index
    %c0_104 = arith.constant 0 : index
    %352 = vector.load %arg4[%c0_103, %c0_104] : memref<32x128xbf16, #tpu.memory_space<vmem>>, vector<32x128xbf16>
    %cst_105 = arith.constant dense<0.000000e+00> : vector<8x128xf32>
    %353 = tpu.matmul %351, %352, %cst_105 {dimension_numbers = #tpu.dot_dimension_numbers<[1], [0], [0], [1], [0, 0, 1, 1], [], []>} : vector<8x32xbf16>, vector<32x128xbf16>, vector<8x128xf32> -> vector<8x128xf32>
    %354 = arith.truncf %329 : vector<8x32xf32> to vector<8x32xbf16>
    %c0_106 = arith.constant 0 : index
    %c0_107 = arith.constant 0 : index
    %355 = vector.load %arg5[%c0_106, %c0_107] : memref<32x128xbf16, #tpu.memory_space<vmem>>, vector<32x128xbf16>
    %cst_108 = arith.constant dense<0.000000e+00> : vector<8x128xf32>
    %356 = tpu.matmul %354, %355, %cst_108 {dimension_numbers = #tpu.dot_dimension_numbers<[1], [0], [0], [1], [0, 0, 1, 1], [], []>} : vector<8x32xbf16>, vector<32x128xbf16>, vector<8x128xf32> -> vector<8x128xf32>
    %357 = arith.addf %353, %356 : vector<8x128xf32>
    %358 = arith.addf %357, %10 : vector<8x128xf32>
    %359 = vector.extract_strided_slice %358 {offsets = [0, 0], sizes = [8, 96], strides = [1, 1]} : vector<8x128xf32> to vector<8x96xf32>
    %360 = arith.negf %359 : vector<8x96xf32>
    %361 = math.exp %360 : vector<8x96xf32>
    %cst_109 = arith.constant 1.000000e+00 : f32
    %362 = vector.broadcast %cst_109 : f32 to vector<8x96xf32>
    %363 = arith.addf %362, %361 : vector<8x96xf32>
    %364 = arith.divf %362, %363 : vector<8x96xf32>
    %365 = vector.extract_strided_slice %358 {offsets = [0, 96], sizes = [8, 32], strides = [1, 1]} : vector<8x128xf32> to vector<8x32xf32>
    %366 = math.tanh %365 : vector<8x32xf32>
    %367 = vector.extract_strided_slice %364 {offsets = [0, 0], sizes = [8, 32], strides = [1, 1]} : vector<8x96xf32> to vector<8x32xf32>
    %368 = vector.extract_strided_slice %364 {offsets = [0, 32], sizes = [8, 32], strides = [1, 1]} : vector<8x96xf32> to vector<8x32xf32>
    %369 = vector.extract_strided_slice %364 {offsets = [0, 64], sizes = [8, 32], strides = [1, 1]} : vector<8x96xf32> to vector<8x32xf32>
    %370 = arith.mulf %368, %327 : vector<8x32xf32>
    %371 = arith.mulf %367, %366 : vector<8x32xf32>
    %372 = arith.addf %370, %371 : vector<8x32xf32>
    %373 = math.tanh %372 : vector<8x32xf32>
    %374 = arith.mulf %369, %373 : vector<8x32xf32>
    %375 = arith.truncf %374 : vector<8x32xf32> to vector<8x32xbf16>
    %c0_110 = arith.constant 0 : index
    %c0_111 = arith.constant 0 : index
    %376 = vector.load %arg7[%c0_110, %c0_111] : memref<32x128xbf16, #tpu.memory_space<vmem>>, vector<32x128xbf16>
    %cst_112 = arith.constant dense<0.000000e+00> : vector<8x128xf32>
    %377 = tpu.matmul %375, %376, %cst_112 {dimension_numbers = #tpu.dot_dimension_numbers<[1], [0], [0], [1], [0, 0, 1, 1], [], []>} : vector<8x32xbf16>, vector<32x128xbf16>, vector<8x128xf32> -> vector<8x128xf32>
    %c0_113 = arith.constant 0 : index
    %c0_114 = arith.constant 0 : index
    %378 = vector.load %arg8[%c0_113, %c0_114] : memref<1x128xf32, #tpu.memory_space<vmem>>, vector<1x128xf32>
    %379 = vector.broadcast %378 : vector<1x128xf32> to vector<8x128xf32>
    %380 = arith.addf %377, %379 : vector<8x128xf32>
    %c0_115 = arith.constant 0 : index
    %c0_116 = arith.constant 0 : index
    %381 = vector.load %arg9[%c0_115, %c0_116] : memref<8x128xf32, #tpu.memory_space<vmem>>, vector<8x128xf32>
    tpu.vector_store %arg9[%c0_115, %c0_116], %380 {strides = array<i32>} : memref<8x128xf32, #tpu.memory_space<vmem>>, vector<8x128xf32>,
    return
  }
}

</mosaic_0001>

<bundles_post_ra>
// kernel: stock_price_predictor.1
= control target key start
LH: loop header
LB: loop body
LE: loop exit
PB: predicated region body
PF: predicated region fallthrough
CT: control target
= control target key end

     0   :  { %vm66_vm0 = vcmask 1041408   ;;  %v2244_v1 = vmov 0.0   ;;  %vm2245_vm1 = vmmov 0   ;;  %vm53_vm2 = vcmask 31744   ;;  %s2247_s24 = smov 32   ;;  %s2719_s1 = inlined_call_operand.vmem [shape: bf16[4,128], index: 1, kind: input, shape index: {}]   ;;  %s2720_s2 = inlined_call_operand.vmem [shape: bf16[32,128], index: 2, kind: input, shape index: {}]   ;;  %s2721_s0 = inlined_call_operand.vmem [shape: f32[64,4], index: 0, kind: input, shape index: {}]   ;;  %s2722_s3 = inlined_call_operand.vmem [shape: f32[1,128], index: 3, kind: input, shape index: {}]   ;;  %s2723_s5 = inlined_call_operand.vmem [shape: bf16[32,128], index: 5, kind: input, shape index: {}]   ;;  %s2724_s4 = inlined_call_operand.vmem [shape: bf16[32,128], index: 4, kind: input, shape index: {}]   ;;  %s2725_s6 = inlined_call_operand.vmem [shape: f32[1,128], index: 6, kind: input, shape index: {}]   ;;  %s2726_s7 = inlined_call_operand.vmem [shape: bf16[32,128], index: 7, kind: input, shape index: {}]   ;;  %s2727_s8 = inlined_call_operand.vmem [shape: f32[1,128], index: 8, kind: input, shape index: {}]   ;;  %s2728_s9 = inlined_call_operand.vmem [shape: f32[8,128], index: 9, kind: output, shape index: {}]  }
   0x1   :  { %v45_v0 = vld [vmem:[%s2719_s1] sm:$0x3]  ;;  %1894 = vmatprep.subr.bf16.mxu1 %v2244_v1  ;;  %1898 = vmatprep.mubr.msk.bf16.mxu1 %vm2245_vm1, %v2244_v1  ;;  %v2308_v3 = vld [vmem:[%s2720_s2 + $0x8] sm:$0xff]   ;;  %v35_v7 = vld [vmem:[%s2721_s0 + $0x10] sm:$0xff]  ;;  %v2246_v11 = vmov 0   ;;  %vm167_vm3 = vcmask 261120  }
   0x2   :  { %2094 = vmatprep.subr.msk.bf16.mxu0 %vm66_vm0, %v45_v0  ;;  %v68_v2 = vsel %vm66_vm0, %v45_v0, 0  ;;  %v33_v4 = vld [vmem:[%s2721_s0] sm:$0xff]  ;;  %v34_v5 = vld [vmem:[%s2721_s0 + $0x8] sm:$0xff]  ;;  %v36_v8 = vld [vmem:[%s2721_s0 + $0x18] sm:$0xff]  ;;  %1895 = vmatpush3.bf16.msra.mxu1 %v2308_v3 }
   0x3   :  { %1885 = vmatpush3.bf16.msra.mxu0 %v68_v2  ;;  %v41_v6 = vpack.c.bf16 %v34_v5, %v33_v4  ;;  %v42_v9 = vpack.c.bf16 %v36_v8, %v35_v7  ;;  %v2326_v10 = vld [vmem:[%s2720_s2] sm:$0xff]   ;;  %1896 = vmatprep.subr.bf16.mxu1 %v2244_v1  ;;  %v38_v32 = vld [vmem:[%s2721_s0 + $0x28] sm:$0xff]  ;;  %v39_v33 = vld [vmem:[%s2721_s0 + $0x30] sm:$0xff] }
   0x4   :  { %1910 = vmatprep.subr.bf16.mxu0 %v2244_v1  ;;  %v2341_v13 = vld [vmem:[%s2722_s3] ss:$0 sm:$0xff]  ;;  %v2361_v34 = vld [vmem:[%s2723_s5 + $0x8] sm:$0xff]   ;;  %v40_v38 = vld [vmem:[%s2721_s0 + $0x38] sm:$0xff] }
   0x5   :  { %1886 = vmatprep.mubr.msk.bf16.mxu0 %vm53_vm2, %v41_v6  ;;  %v37_v31 = vld [vmem:[%s2721_s0 + $0x20] sm:$0xff]  ;;  %v2366_v36 = vld [vmem:[%s2724_s4 + $0x8] sm:$0xff]   ;;  %v44_v39 = vpack.c.bf16 %v40_v38, %v39_v33  ;;  %s2248_s0 = smov 64  }
   0x6   :  { %1887 = vmatmul.mubr.msk.bf16.vlgmr.msra.gmra.mxu0 %vm53_vm2, %v42_v9  ;;  %1897 = vmatpush3.bf16.msra.mxu1 %v2326_v10  ;;  %v43_v35 = vpack.c.bf16 %v38_v32, %v37_v31  ;;  %v2373_v37 = vld [vmem:[%s2723_s5] sm:$0xff]  }
   0x7   :  { %1902 = vmatprep.subr.bf16.mxu1 %v2244_v1  ;;  %1911 = vmatpush3.bf16.msra.mxu0 %v2366_v36  ;;  %v2384_v40 = vld [vmem:[%s2724_s4] sm:$0xff]  }
   0x8   :  { %1890 = vmatprep.mubr.msk.bf16.mxu0 %vm53_vm2, %v43_v35  ;;  %1912 = vmatprep.subr.bf16.mxu0 %v2244_v1  ;;  %v2429_v57 = vld [vmem:[%s2725_s6] ss:$0 sm:$0xff] }
   0x9   :  { %1899 = vmatmul.mubr.bf16.vlgmr.msra.gmra.mxu1 %v2246_v11 }
   0xa   :  { %1906 = vmatprep.mubr.msk.bf16.mxu1 %vm2245_vm1, %v2244_v1  ;;  %1903 = vmatpush3.bf16.msra.mxu1 %v2361_v34 }
   0xb   :  { %1904 = vmatprep.subr.bf16.mxu1 %v2244_v1  ;;  %1913 = vmatpush3.bf16.msra.mxu0 %v2384_v40 }
   0xc   :  { %1926 = vmatprep.subr.bf16.mxu0 %v2244_v1 }
   0xe   :  { %1905 = vmatpush3.bf16.msra.mxu1 %v2373_v37  ;;  %1891 = vmatmul.mubr.msk.bf16.gmra.mxu0 %vm53_vm2, %v44_v39 }
   0xf   :  { %1918 = vmatprep.subr.bf16.mxu1 %v2244_v1  ;;  %1914 = vmatprep.mubr.msk.bf16.mxu0 %vm2245_vm1, %v2244_v1 }
  0x11   :  { %1907 = vmatmul.mubr.bf16.vlgmr.msra.gmra.mxu1 %v2246_v11 }
  0x12   :  { %1919 = vmatpush3.bf16.msra.mxu1 %v2308_v3  ;;  %1922 = vmatprep.mubr.msk.bf16.mxu1 %vm2245_vm1, %v2244_v1 }
  0x13   :  { %1920 = vmatprep.subr.bf16.mxu1 %v2244_v1 }
  0x16   :  { %1921 = vmatpush3.bf16.msra.mxu1 %v2326_v10 }
  0x17   :  { %1934 = vmatprep.subr.bf16.mxu1 %v2244_v1 }
  0xc6   :  { %v2336_v12 = vpop.f32.mrf.mxu0 }
  0xc8   :  { %v104_v14 = vpop.f32.mrf.mxu0 }
  0xc9   :  { %v105_v15 = vadd.f32 %v2341_v13, %v104_v14  ;;  %v205_v16 = vpop.f32.mrf.mxu1 }
  0xca   :  { %v2415_v50 = vpop.f32.mrf.mxu0 }
  0xcb   :  { %v211_v17 = vadd.f32 %v205_v16, %v105_v15  ;;  %v1900_v18 = vpop.f32.mrf.mxu1 }
  0xcc   :  { %v107_v51 = vpop.f32.mrf.mxu0 }
  0xcd   :  { %2108 = vtanh.f32 %v211_v17  ;;  %v208_v19 = vpop.f32.mrf.mxu1  ;;  %v1758_v22 = vmul.f32 -1.442695, %v211_v17  ;;  %v108_v56 = vadd.f32 %v2341_v13, %v107_v51 }
  0xce   :  { %v2417_v52 = vpop.f32.mrf.mxu0 }
  0xcf   :  { %v1901_v20 = vpop.f32.mrf.mxu1  ;;  %2110 = vpow2.f32 %v1758_v22 }
  0xd0   :  { %v2419_v53 = vpop.f32.mrf.mxu0 }
  0xd1   :  { %v291_v45 = vpop.f32.mrf.mxu1 }
  0xd2   :  { %v2421_v54 = vpop.f32.mrf.mxu0 }
  0xd3   :  { %v1908_v46 = vpop.f32.mrf.mxu1 }
  0xd4   :  { %v2423_v55 = vpop.f32.mrf.mxu0 }
  0xd5   :  { %v294_v47 = vpop.f32.mrf.mxu1 }
  0xd7   :  { %v1909_v48 = vpop.f32.mrf.mxu1 }
  0xda   :  { %v2109_v21 = vpop.eup %2108 }
  0xdb   :  { %221 = vrot.lane.b32.xlu0 %v2109_v21, %s2247_s24 }
  0xdc   :  { %v2111_v23 = vpop.eup %2110 }
  0xdd   :  { %v215_v24 = vadd.f32 1.0, %v2111_v23 }
  0xdf   :  { %2112 = vrcp.f32 %v215_v24 }
  0xec   :  { %v2113_v25 = vpop.eup %2112 }
  0xed   :  { %v219_v28 = vmul.f32 0.0, %v2113_v25 }
 0x14d   :  { %v222_v26 = vpop.permute.xlu0 %221 }
 0x14e   :  { %v224_v27 = vmul.f32 %v2113_v25, %v222_v26 }
 0x150   :  { %226 = vrot.lane.b32.xlu0 %v224_v27, %s2247_s24 }
 0x1c2   :  { %v227_v29 = vpop.permute.xlu0 %226 }
 0x1c3   :  { %v2346_v30 = vadd.f32 %v227_v29, %v219_v28 }
 0x1c5   :  { %2114 = vtanh.f32 %v2346_v30 }
 0x1d2   :  { %v2115_v41 = vpop.eup %2114 }
 0x1d3   :  { %232 = vrot.lane.b32.xlu1 %v2115_v41, %s2247_s24 }
 0x245   :  { %v233_v42 = vpop.permute.xlu1 %232 }
 0x246   :  { %v235_v43 = vmul.f32 %v2113_v25, %v233_v42 }
 0x248   :  { %v236_v44 = vpack.c.bf16 %v235_v43, %v235_v43 }
 0x24a   :  { %298 = vrot.lane.b32.xlu1 %v236_v44, %s2248_s0 }
 0x2bc   :  { %v299_v49 = vpop.permute.xlu1 %298 }
 0x2bd   :  { %1915 = vmatmul.mubr.msk.bf16.vlgmr.msra.gmra.mxu0 %vm167_vm3, %v299_v49  ;;  %1923 = vmatmul.mubr.msk.bf16.vlgmr.msra.gmra.mxu1 %vm167_vm3, %v299_v49 }
 0x2be   :  { %1935 = vmatpush3.bf16.msra.mxu1 %v2366_v36  ;;  %1927 = vmatpush3.bf16.msra.mxu0 %v2361_v34 }
 0x2bf   :  { %1936 = vmatprep.subr.bf16.mxu1 %v2244_v1  ;;  %1928 = vmatprep.subr.bf16.mxu0 %v2244_v1 }
 0x2c0   :  { %1938 = vmatprep.mubr.msk.bf16.mxu1 %vm2245_vm1, %v2244_v1  ;;  %1930 = vmatprep.mubr.msk.bf16.mxu0 %vm2245_vm1, %v2244_v1 }
 0x2c2   :  { %1937 = vmatpush3.bf16.msra.mxu1 %v2384_v40  ;;  %1929 = vmatpush3.bf16.msra.mxu0 %v2373_v37 }
 0x2c3   :  { %1942 = vmatprep.subr.bf16.mxu0 %v2244_v1  ;;  %1950 = vmatprep.subr.bf16.mxu1 %v2244_v1 }
 0x37d   :  { %v349_v58 = vpop.f32.mrf.mxu0  ;;  %v415_v59 = vpop.f32.mrf.mxu1 }
 0x37e   :  { %v350_v60 = vadd.f32 %v349_v58, %v291_v45  ;;  %v421_v61 = vadd.f32 %v415_v59, %v108_v56 }
 0x37f   :  { %v1916_v62 = vpop.f32.mrf.mxu0  ;;  %v1924_v63 = vpop.f32.mrf.mxu1 }
 0x380   :  { %v355_v0 = vadd.f32 %v2429_v57, %v350_v60  ;;  %2116 = vtanh.f32 %v421_v61  ;;  %v1766_v9 = vmul.f32 -1.442695, %v421_v61  ;;  %v113_v60 = vadd.f32 %v2336_v12, %v2341_v13 }
 0x381   :  { %v352_v2 = vpop.f32.mrf.mxu0  ;;  %v418_v4 = vpop.f32.mrf.mxu1 }
 0x382   :  { %2118 = vtanh.f32 %v355_v0  ;;  %v1764_v11 = vmul.f32 -1.442695, %v355_v0 }
 0x383   :  { %v1917_v5 = vpop.f32.mrf.mxu0  ;;  %v1925_v6 = vpop.f32.mrf.mxu1  ;;  %2120 = vpow2.f32 %v1766_v9 }
 0x384   :  { %2122 = vpow2.f32 %v1764_v11 }
 0x38d   :  { %v2117_v7 = vpop.eup %2116 }
 0x38e   :  { %431 = vrot.lane.b32.xlu1 %v2117_v7, %s2247_s24 }
 0x38f   :  { %v2119_v8 = vpop.eup %2118 }
 0x390   :  { %365 = vrot.lane.b32.xlu0 %v2119_v8, %s2247_s24  ;;  %v2121_v14 = vpop.eup %2120 }
 0x391   :  { %v2123_v15 = vpop.eup %2122  ;;  %v425_v16 = vadd.f32 1.0, %v2121_v14 }
 0x392   :  { %v359_v17 = vadd.f32 1.0, %v2123_v15 }
 0x393   :  { %2124 = vrcp.f32 %v425_v16 }
 0x394   :  { %2126 = vrcp.f32 %v359_v17 }
 0x3a0   :  { %v2125_v18 = vpop.eup %2124 }
 0x3a1   :  { %v2127_v21 = vpop.eup %2126  ;;  %v429_v24 = vmul.f32 %v2125_v18, %v2346_v30 }
 0x3a2   :  { %v363_v27 = vmul.f32 0.0, %v2127_v21 }
 0x400   :  { %v432_v19 = vpop.permute.xlu1 %431 }
 0x401   :  { %v434_v20 = vmul.f32 %v2125_v18, %v432_v19 }
 0x402   :  { %v366_v22 = vpop.permute.xlu0 %365 }
 0x403   :  { %v368_v23 = vmul.f32 %v2127_v21, %v366_v22  ;;  %436 = vrot.lane.b32.xlu1 %v434_v20, %s2247_s24 }
 0x405   :  { %370 = vrot.lane.b32.xlu0 %v368_v23, %s2247_s24 }
 0x475   :  { %v437_v25 = vpop.permute.xlu1 %436 }
 0x476   :  { %v2437_v26 = vadd.f32 %v437_v25, %v429_v24 }
 0x477   :  { %v371_v28 = vpop.permute.xlu0 %370 }
 0x478   :  { %2128 = vtanh.f32 %v2437_v26  ;;  %v2440_v29 = vadd.f32 %v371_v28, %v363_v27 }
 0x47a   :  { %2130 = vtanh.f32 %v2440_v29 }
 0x485   :  { %v2129_v31 = vpop.eup %2128 }
 0x486   :  { %442 = vrot.lane.b32.xlu1 %v2129_v31, %s2247_s24 }
 0x487   :  { %v2131_v32 = vpop.eup %2130 }
 0x488   :  { %376 = vrot.lane.b32.xlu0 %v2131_v32, %s2247_s24 }
 0x4f8   :  { %v443_v33 = vpop.permute.xlu1 %442 }
 0x4f9   :  { %v445_v35 = vmul.f32 %v2125_v18, %v443_v33 }
 0x4fa   :  { %v377_v30 = vpop.permute.xlu0 %376 }
 0x4fb   :  { %v446_v38 = vpack.c.bf16 %v445_v35, %v445_v35  ;;  %v379_v39 = vmul.f32 %v2127_v21, %v377_v30 }
 0x4fd   :  { %v447_v41 = vpack.c.bf16 %v379_v39, %v379_v39  ;;  %495 = vrot.lane.b32.xlu1 %v446_v38, %s2248_s0 }
 0x4ff   :  { %449 = vrot.lane.b32.xlu0 %v447_v41, %s2248_s0 }
 0x56f   :  { %v496_v42 = vpop.permute.xlu1 %495 }
 0x570   :  { %1939 = vmatmul.mubr.msk.bf16.vlgmr.msra.gmra.mxu1 %vm167_vm3, %v496_v42 }
 0x571   :  { %v450_v43 = vpop.permute.xlu0 %449  ;;  %1951 = vmatpush3.bf16.msra.mxu1 %v2361_v34  ;;  %1954 = vmatprep.mubr.msk.bf16.mxu1 %vm2245_vm1, %v2244_v1 }
 0x572   :  { %1931 = vmatmul.mubr.msk.bf16.vlgmr.msra.gmra.mxu0 %vm167_vm3, %v450_v43  ;;  %1952 = vmatprep.subr.bf16.mxu1 %v2244_v1 }
 0x573   :  { %1943 = vmatpush3.bf16.msra.mxu0 %v2308_v3  ;;  %1946 = vmatprep.mubr.msk.bf16.mxu0 %vm2245_vm1, %v2244_v1 }
 0x574   :  { %1944 = vmatprep.subr.bf16.mxu0 %v2244_v1 }
 0x575   :  { %1953 = vmatpush3.bf16.msra.mxu1 %v2373_v37 }
 0x576   :  { %1966 = vmatprep.subr.bf16.mxu1 %v2244_v1 }
 0x577   :  { %1945 = vmatpush3.bf16.msra.mxu0 %v2326_v10 }
 0x578   :  { %1958 = vmatprep.subr.bf16.mxu0 %v2244_v1 }
 0x57a   :  { %1947 = vmatmul.mubr.msk.bf16.vlgmr.msra.gmra.mxu0 %vm167_vm3, %v496_v42 }
 0x57b   :  { %1959 = vmatpush3.bf16.msra.mxu0 %v2366_v36  ;;  %1962 = vmatprep.mubr.msk.bf16.mxu0 %vm2245_vm1, %v2244_v1 }
 0x57c   :  { %1960 = vmatprep.subr.bf16.mxu0 %v2244_v1 }
 0x57f   :  { %1961 = vmatpush3.bf16.msra.mxu0 %v2384_v40 }
 0x580   :  { %1974 = vmatprep.subr.bf16.mxu0 %v2244_v1 }
 0x630   :  { %v534_v44 = vpop.f32.mrf.mxu1 }
 0x632   :  { %v488_v45 = vpop.f32.mrf.mxu0  ;;  %v1940_v46 = vpop.f32.mrf.mxu1 }
 0x633   :  { %v535_v47 = vadd.f32 %v534_v44, %v488_v45  ;;  %v116_v45 = vadd.f32 %v2415_v50, %v2341_v13 }
 0x634   :  { %v1932_v48 = vpop.f32.mrf.mxu0  ;;  %v537_v49 = vpop.f32.mrf.mxu1 }
 0x635   :  { %v540_v51 = vadd.f32 %v2429_v57, %v535_v47 }
 0x636   :  { %v491_v56 = vpop.f32.mrf.mxu0  ;;  %v1941_v58 = vpop.f32.mrf.mxu1 }
 0x637   :  { %2132 = vtanh.f32 %v540_v51  ;;  %v1769_v6 = vmul.f32 -1.442695, %v540_v51 }
 0x638   :  { %v1933_v59 = vpop.f32.mrf.mxu0 }
 0x63a   :  { %v600_v61 = vpop.f32.mrf.mxu0 }
 0x63b   :  { %v606_v62 = vadd.f32 %v600_v61, %v113_v60 }
 0x63c   :  { %v1948_v63 = vpop.f32.mrf.mxu0 }
 0x63d   :  { %2134 = vtanh.f32 %v606_v62  ;;  %v1771_v7 = vmul.f32 -1.442695, %v606_v62 }
 0x63e   :  { %v603_v0 = vpop.f32.mrf.mxu0  ;;  %2136 = vpow2.f32 %v1769_v6 }
 0x63f   :  { %2138 = vpow2.f32 %v1771_v7 }
 0x640   :  { %v1949_v2 = vpop.f32.mrf.mxu0 }
 0x644   :  { %v2133_v4 = vpop.eup %2132 }
 0x645   :  { %550 = vrot.lane.b32.xlu0 %v2133_v4, %s2247_s24 }
 0x64a   :  { %v2135_v5 = vpop.eup %2134 }
 0x64b   :  { %616 = vrot.lane.b32.xlu1 %v2135_v5, %s2247_s24  ;;  %v2137_v8 = vpop.eup %2136 }
 0x64c   :  { %v544_v9 = vadd.f32 1.0, %v2137_v8  ;;  %v2139_v11 = vpop.eup %2138 }
 0x64d   :  { %v610_v12 = vadd.f32 1.0, %v2139_v11 }
 0x64e   :  { %2140 = vrcp.f32 %v544_v9 }
 0x64f   :  { %2142 = vrcp.f32 %v610_v12 }
 0x65b   :  { %v2141_v14 = vpop.eup %2140 }
 0x65c   :  { %v2143_v17 = vpop.eup %2142  ;;  %v548_v20 = vmul.f32 %v2141_v14, %v2440_v29 }
 0x65d   :  { %v614_v23 = vmul.f32 %v2143_v17, %v2437_v26 }
 0x6b7   :  { %v551_v15 = vpop.permute.xlu0 %550 }
 0x6b8   :  { %v553_v16 = vmul.f32 %v2141_v14, %v551_v15 }
 0x6ba   :  { %555 = vrot.lane.b32.xlu0 %v553_v16, %s2247_s24 }
 0x6bd   :  { %v617_v18 = vpop.permute.xlu1 %616 }
 0x6be   :  { %v619_v19 = vmul.f32 %v2143_v17, %v617_v18 }
 0x6c0   :  { %621 = vrot.lane.b32.xlu1 %v619_v19, %s2247_s24 }
 0x72c   :  { %v556_v21 = vpop.permute.xlu0 %555 }
 0x72d   :  { %v2476_v22 = vadd.f32 %v556_v21, %v548_v20 }
 0x72f   :  { %2144 = vtanh.f32 %v2476_v22 }
 0x732   :  { %v622_v24 = vpop.permute.xlu1 %621 }
 0x733   :  { %v2480_v25 = vadd.f32 %v622_v24, %v614_v23 }
 0x735   :  { %2146 = vtanh.f32 %v2480_v25 }
 0x73c   :  { %v2145_v27 = vpop.eup %2144 }
 0x73d   :  { %561 = vrot.lane.b32.xlu0 %v2145_v27, %s2247_s24 }
 0x742   :  { %v2147_v28 = vpop.eup %2146 }
 0x743   :  { %627 = vrot.lane.b32.xlu1 %v2147_v28, %s2247_s24 }
 0x7af   :  { %v562_v31 = vpop.permute.xlu0 %561 }
 0x7b0   :  { %v564_v29 = vmul.f32 %v2141_v14, %v562_v31 }
 0x7b2   :  { %v632_v32 = vpack.c.bf16 %v564_v29, %v564_v29 }
 0x7b4   :  { %634 = vrot.lane.b32.xlu0 %v632_v32, %s2248_s0 }
 0x7b5   :  { %v628_v33 = vpop.permute.xlu1 %627 }
 0x7b6   :  { %v630_v35 = vmul.f32 %v2143_v17, %v628_v33 }
 0x7b8   :  { %v631_v30 = vpack.c.bf16 %v630_v35, %v630_v35 }
 0x7ba   :  { %680 = vrot.lane.b32.xlu1 %v631_v30, %s2248_s0 }
 0x826   :  { %v635_v26 = vpop.permute.xlu0 %634 }
 0x827   :  { %1955 = vmatmul.mubr.msk.bf16.vlgmr.msra.gmra.mxu1 %vm167_vm3, %v635_v26 }
 0x828   :  { %1967 = vmatpush3.bf16.msra.mxu1 %v2308_v3  ;;  %1970 = vmatprep.mubr.msk.bf16.mxu1 %vm2245_vm1, %v2244_v1 }
 0x829   :  { %1968 = vmatprep.subr.bf16.mxu1 %v2244_v1 }
 0x82c   :  { %1969 = vmatpush3.bf16.msra.mxu1 %v2326_v10  ;;  %v681_v38 = vpop.permute.xlu1 %680 }
 0x82d   :  { %1963 = vmatmul.mubr.msk.bf16.vlgmr.msra.gmra.mxu0 %vm167_vm3, %v681_v38  ;;  %1982 = vmatprep.subr.bf16.mxu1 %v2244_v1 }
 0x82e   :  { %1975 = vmatpush3.bf16.msra.mxu0 %v2361_v34  ;;  %1978 = vmatprep.mubr.msk.bf16.mxu0 %vm2245_vm1, %v2244_v1 }
 0x82f   :  { %1971 = vmatmul.mubr.msk.bf16.vlgmr.msra.gmra.mxu1 %vm167_vm3, %v681_v38  ;;  %1976 = vmatprep.subr.bf16.mxu0 %v2244_v1 }
 0x830   :  { %1983 = vmatpush3.bf16.msra.mxu1 %v2366_v36  ;;  %1986 = vmatprep.mubr.msk.bf16.mxu1 %vm2245_vm1, %v2244_v1 }
 0x831   :  { %1984 = vmatprep.subr.bf16.mxu1 %v2244_v1 }
 0x832   :  { %1977 = vmatpush3.bf16.msra.mxu0 %v2373_v37 }
 0x833   :  { %1990 = vmatprep.subr.bf16.mxu0 %v2244_v1 }
 0x834   :  { %1985 = vmatpush3.bf16.msra.mxu1 %v2384_v40 }
 0x835   :  { %1998 = vmatprep.subr.bf16.mxu1 %v2244_v1 }
 0x8e7   :  { %v673_v39 = vpop.f32.mrf.mxu1 }
 0x8e9   :  { %v1956_v41 = vpop.f32.mrf.mxu1 }
 0x8eb   :  { %v676_v42 = vpop.f32.mrf.mxu1 }
 0x8ed   :  { %v1957_v43 = vpop.f32.mrf.mxu1  ;;  %v719_v44 = vpop.f32.mrf.mxu0 }
 0x8ee   :  { %v720_v46 = vadd.f32 %v719_v44, %v673_v39  ;;  %v121_v44 = vadd.f32 %v2341_v13, %v2419_v53 }
 0x8ef   :  { %v1964_v47 = vpop.f32.mrf.mxu0  ;;  %v785_v48 = vpop.f32.mrf.mxu1 }
 0x8f0   :  { %v725_v49 = vadd.f32 %v2429_v57, %v720_v46  ;;  %v791_v51 = vadd.f32 %v785_v48, %v116_v45 }
 0x8f1   :  { %v722_v56 = vpop.f32.mrf.mxu0  ;;  %v1972_v58 = vpop.f32.mrf.mxu1 }
 0x8f2   :  { %2148 = vtanh.f32 %v725_v49  ;;  %v1774_v50 = vmul.f32 -1.442695, %v725_v49  ;;  %v1776_v0 = vmul.f32 -1.442695, %v791_v51 }
 0x8f3   :  { %2150 = vtanh.f32 %v791_v51  ;;  %v1965_v59 = vpop.f32.mrf.mxu0  ;;  %v788_v60 = vpop.f32.mrf.mxu1 }
 0x8f4   :  { %2152 = vpow2.f32 %v1774_v50 }
 0x8f5   :  { %v1973_v61 = vpop.f32.mrf.mxu1  ;;  %2154 = vpow2.f32 %v1776_v0 }
 0x8ff   :  { %v2149_v62 = vpop.eup %2148 }
 0x900   :  { %v2151_v63 = vpop.eup %2150  ;;  %735 = vrot.lane.b32.xlu0 %v2149_v62, %s2247_s24 }
 0x901   :  { %801 = vrot.lane.b32.xlu1 %v2151_v63, %s2247_s24  ;;  %v2153_v2 = vpop.eup %2152 }
 0x902   :  { %v2155_v4 = vpop.eup %2154  ;;  %v729_v5 = vadd.f32 1.0, %v2153_v2 }
 0x903   :  { %v795_v6 = vadd.f32 1.0, %v2155_v4 }
 0x904   :  { %2156 = vrcp.f32 %v729_v5 }
 0x905   :  { %2158 = vrcp.f32 %v795_v6 }
 0x911   :  { %v2157_v7 = vpop.eup %2156 }
 0x912   :  { %v2159_v9 = vpop.eup %2158  ;;  %v733_v15 = vmul.f32 %v2157_v7, %v2476_v22 }
 0x913   :  { %v799_v16 = vmul.f32 %v2159_v9, %v2480_v25 }
 0x972   :  { %v736_v8 = vpop.permute.xlu0 %735 }
 0x973   :  { %v802_v11 = vpop.permute.xlu1 %801  ;;  %v738_v12 = vmul.f32 %v2157_v7, %v736_v8 }
 0x974   :  { %v804_v14 = vmul.f32 %v2159_v9, %v802_v11 }
 0x975   :  { %740 = vrot.lane.b32.xlu0 %v738_v12, %s2247_s24 }
 0x976   :  { %806 = vrot.lane.b32.xlu1 %v804_v14, %s2247_s24 }
 0x9e7   :  { %v741_v17 = vpop.permute.xlu0 %740 }
 0x9e8   :  { %v807_v18 = vpop.permute.xlu1 %806  ;;  %v2517_v19 = vadd.f32 %v741_v17, %v733_v15 }
 0x9e9   :  { %v2519_v20 = vadd.f32 %v807_v18, %v799_v16 }
 0x9ea   :  { %2160 = vtanh.f32 %v2517_v19 }
 0x9eb   :  { %2162 = vtanh.f32 %v2519_v20 }
 0x9f7   :  { %v2161_v21 = vpop.eup %2160 }
 0x9f8   :  { %v2163_v23 = vpop.eup %2162  ;;  %746 = vrot.lane.b32.xlu0 %v2161_v21, %s2247_s24 }
 0x9f9   :  { %812 = vrot.lane.b32.xlu1 %v2163_v23, %s2247_s24 }
 0xa6a   :  { %v747_v24 = vpop.permute.xlu0 %746 }
 0xa6b   :  { %v813_v22 = vpop.permute.xlu1 %812  ;;  %v749_v27 = vmul.f32 %v2157_v7, %v747_v24 }
 0xa6c   :  { %v815_v25 = vmul.f32 %v2159_v9, %v813_v22 }
 0xa6d   :  { %v817_v28 = vpack.c.bf16 %v749_v27, %v749_v27 }
 0xa6e   :  { %v816_v31 = vpack.c.bf16 %v815_v25, %v815_v25 }
 0xa6f   :  { %819 = vrot.lane.b32.xlu0 %v817_v28, %s2248_s0 }
 0xa70   :  { %865 = vrot.lane.b32.xlu1 %v816_v31, %s2248_s0 }
 0xae1   :  { %v820_v29 = vpop.permute.xlu0 %819 }
 0xae2   :  { %v866_v32 = vpop.permute.xlu1 %865  ;;  %1979 = vmatmul.mubr.msk.bf16.vlgmr.msra.gmra.mxu0 %vm167_vm3, %v820_v29 }
 0xae3   :  { %1987 = vmatmul.mubr.msk.bf16.vlgmr.msra.gmra.mxu1 %vm167_vm3, %v866_v32  ;;  %1991 = vmatpush3.bf16.msra.mxu0 %v2308_v3 }
 0xae4   :  { %1992 = vmatprep.subr.bf16.mxu0 %v2244_v1  ;;  %1994 = vmatprep.mubr.msk.bf16.mxu0 %vm2245_vm1, %v2244_v1 }
 0xae5   :  { %1999 = vmatpush3.bf16.msra.mxu1 %v2361_v34  ;;  %2002 = vmatprep.mubr.msk.bf16.mxu1 %vm2245_vm1, %v2244_v1 }
 0xae6   :  { %2000 = vmatprep.subr.bf16.mxu1 %v2244_v1 }
 0xae7   :  { %1993 = vmatpush3.bf16.msra.mxu0 %v2326_v10 }
 0xae8   :  { %2006 = vmatprep.subr.bf16.mxu0 %v2244_v1 }
 0xae9   :  { %2001 = vmatpush3.bf16.msra.mxu1 %v2373_v37 }
 0xaea   :  { %1995 = vmatmul.mubr.msk.bf16.vlgmr.msra.gmra.mxu0 %vm167_vm3, %v866_v32  ;;  %2014 = vmatprep.subr.bf16.mxu1 %v2244_v1 }
 0xaeb   :  { %2007 = vmatpush3.bf16.msra.mxu0 %v2366_v36  ;;  %2010 = vmatprep.mubr.msk.bf16.mxu0 %vm2245_vm1, %v2244_v1 }
 0xaec   :  { %2008 = vmatprep.subr.bf16.mxu0 %v2244_v1 }
 0xaef   :  { %2009 = vmatpush3.bf16.msra.mxu0 %v2384_v40 }
 0xaf0   :  { %2022 = vmatprep.subr.bf16.mxu0 %v2244_v1 }
 0xba2   :  { %v858_v33 = vpop.f32.mrf.mxu0 }
 0xba3   :  { %v904_v35 = vpop.f32.mrf.mxu1 }
 0xba4   :  { %v905_v30 = vadd.f32 %v904_v35, %v858_v33  ;;  %v1980_v26 = vpop.f32.mrf.mxu0  ;;  %v124_v33 = vadd.f32 %v2341_v13, %v2423_v55 }
 0xba5   :  { %v1988_v38 = vpop.f32.mrf.mxu1 }
 0xba6   :  { %v910_v39 = vadd.f32 %v2429_v57, %v905_v30  ;;  %v861_v41 = vpop.f32.mrf.mxu0 }
 0xba7   :  { %v907_v42 = vpop.f32.mrf.mxu1 }
 0xba8   :  { %2164 = vtanh.f32 %v910_v39  ;;  %v1981_v43 = vpop.f32.mrf.mxu0  ;;  %v1779_v59 = vmul.f32 -1.442695, %v910_v39 }
 0xba9   :  { %v1989_v45 = vpop.f32.mrf.mxu1 }
 0xbaa   :  { %v970_v46 = vpop.f32.mrf.mxu0 }
 0xbab   :  { %v976_v47 = vadd.f32 %v970_v46, %v121_v44 }
 0xbac   :  { %v1996_v48 = vpop.f32.mrf.mxu0 }
 0xbad   :  { %2166 = vtanh.f32 %v976_v47  ;;  %v1781_v60 = vmul.f32 -1.442695, %v976_v47 }
 0xbae   :  { %v973_v49 = vpop.f32.mrf.mxu0  ;;  %2168 = vpow2.f32 %v1779_v59 }
 0xbaf   :  { %2170 = vpow2.f32 %v1781_v60 }
 0xbb0   :  { %v1997_v51 = vpop.f32.mrf.mxu0 }
 0xbb5   :  { %v2165_v56 = vpop.eup %2164 }
 0xbb6   :  { %920 = vrot.lane.b32.xlu0 %v2165_v56, %s2247_s24 }
 0xbba   :  { %v2167_v58 = vpop.eup %2166 }
 0xbbb   :  { %986 = vrot.lane.b32.xlu1 %v2167_v58, %s2247_s24  ;;  %v2169_v61 = vpop.eup %2168 }
 0xbbc   :  { %v914_v62 = vadd.f32 1.0, %v2169_v61  ;;  %v2171_v53 = vpop.eup %2170 }
 0xbbd   :  { %v980_v63 = vadd.f32 1.0, %v2171_v53 }
 0xbbe   :  { %2172 = vrcp.f32 %v914_v62 }
 0xbbf   :  { %2174 = vrcp.f32 %v980_v63 }
 0xbcb   :  { %v2173_v50 = vpop.eup %2172 }
 0xbcc   :  { %v2175_v4 = vpop.eup %2174  ;;  %v918_v7 = vmul.f32 %v2173_v50, %v2517_v19 }
 0xbcd   :  { %v984_v11 = vmul.f32 %v2175_v4, %v2519_v20 }
 0xc28   :  { %v921_v0 = vpop.permute.xlu0 %920 }
 0xc29   :  { %v923_v2 = vmul.f32 %v2173_v50, %v921_v0 }
 0xc2b   :  { %925 = vrot.lane.b32.xlu0 %v923_v2, %s2247_s24 }
 0xc2d   :  { %v987_v5 = vpop.permute.xlu1 %986 }
 0xc2e   :  { %v989_v6 = vmul.f32 %v2175_v4, %v987_v5 }
 0xc30   :  { %991 = vrot.lane.b32.xlu1 %v989_v6, %s2247_s24 }
 0xc9d   :  { %v926_v8 = vpop.permute.xlu0 %925 }
 0xc9e   :  { %v2556_v9 = vadd.f32 %v926_v8, %v918_v7 }
 0xca0   :  { %2176 = vtanh.f32 %v2556_v9 }
 0xca2   :  { %v992_v12 = vpop.permute.xlu1 %991 }
 0xca3   :  { %v2560_v14 = vadd.f32 %v992_v12, %v984_v11 }
 0xca5   :  { %2178 = vtanh.f32 %v2560_v14 }
 0xcad   :  { %v2177_v15 = vpop.eup %2176 }
 0xcae   :  { %931 = vrot.lane.b32.xlu0 %v2177_v15, %s2247_s24 }
 0xcb2   :  { %v2179_v16 = vpop.eup %2178 }
 0xcb3   :  { %997 = vrot.lane.b32.xlu1 %v2179_v16, %s2247_s24 }
 0xd20   :  { %v932_v17 = vpop.permute.xlu0 %931 }
 0xd21   :  { %v934_v18 = vmul.f32 %v2173_v50, %v932_v17 }
 0xd23   :  { %v1002_v19 = vpack.c.bf16 %v934_v18, %v934_v18 }
 0xd25   :  { %1004 = vrot.lane.b32.xlu0 %v1002_v19, %s2248_s0  ;;  %v998_v21 = vpop.permute.xlu1 %997 }
 0xd26   :  { %v1000_v23 = vmul.f32 %v2175_v4, %v998_v21 }
 0xd28   :  { %v1001_v24 = vpack.c.bf16 %v1000_v23, %v1000_v23 }
 0xd2a   :  { %1050 = vrot.lane.b32.xlu1 %v1001_v24, %s2248_s0  ;;  %v129_v24 = vadd.f32 %v2417_v52, %v2341_v13 }
 0xd97   :  { %v1005_v20 = vpop.permute.xlu0 %1004 }
 0xd98   :  { %2003 = vmatmul.mubr.msk.bf16.vlgmr.msra.gmra.mxu1 %vm167_vm3, %v1005_v20 }
 0xd99   :  { %2015 = vmatpush3.bf16.msra.mxu1 %v2308_v3  ;;  %2018 = vmatprep.mubr.msk.bf16.mxu1 %vm2245_vm1, %v2244_v1 }
 0xd9a   :  { %2016 = vmatprep.subr.bf16.mxu1 %v2244_v1 }
 0xd9c   :  { %v1051_v22 = vpop.permute.xlu1 %1050 }
 0xd9d   :  { %2017 = vmatpush3.bf16.msra.mxu1 %v2326_v10  ;;  %2011 = vmatmul.mubr.msk.bf16.vlgmr.msra.gmra.mxu0 %vm167_vm3, %v1051_v22 }
 0xd9e   :  { %2030 = vmatprep.subr.bf16.mxu1 %v2244_v1  ;;  %2023 = vmatpush3.bf16.msra.mxu0 %v2361_v34 }
 0xd9f   :  { %2024 = vmatprep.subr.bf16.mxu0 %v2244_v1  ;;  %2026 = vmatprep.mubr.msk.bf16.mxu0 %vm2245_vm1, %v2244_v1 }
 0xda0   :  { %2019 = vmatmul.mubr.msk.bf16.vlgmr.msra.gmra.mxu1 %vm167_vm3, %v1051_v22 }
 0xda1   :  { %2031 = vmatpush3.bf16.msra.mxu1 %v2366_v36  ;;  %2034 = vmatprep.mubr.msk.bf16.mxu1 %vm2245_vm1, %v2244_v1 }
 0xda2   :  { %2032 = vmatprep.subr.bf16.mxu1 %v2244_v1  ;;  %2025 = vmatpush3.bf16.msra.mxu0 %v2373_v37 }
 0xda3   :  { %2038 = vmatprep.subr.bf16.mxu0 %v2244_v1 }
 0xda5   :  { %2033 = vmatpush3.bf16.msra.mxu1 %v2384_v40 }
 0xda6   :  { %2046 = vmatprep.subr.bf16.mxu1 %v2244_v1 }
 0xe58   :  { %v1043_v27 = vpop.f32.mrf.mxu1 }
 0xe5a   :  { %v2004_v25 = vpop.f32.mrf.mxu1 }
 0xe5c   :  { %v1046_v28 = vpop.f32.mrf.mxu1 }
 0xe5d   :  { %v1089_v31 = vpop.f32.mrf.mxu0 }
 0xe5e   :  { %v2005_v29 = vpop.f32.mrf.mxu1  ;;  %v1090_v32 = vadd.f32 %v1089_v31, %v1043_v27 }
 0xe5f   :  { %v2012_v35 = vpop.f32.mrf.mxu0 }
 0xe60   :  { %v1095_v30 = vadd.f32 %v2429_v57, %v1090_v32  ;;  %v1155_v26 = vpop.f32.mrf.mxu1 }
 0xe61   :  { %v1161_v38 = vadd.f32 %v1155_v26, %v124_v33  ;;  %v1092_v39 = vpop.f32.mrf.mxu0 }
 0xe62   :  { %2180 = vtanh.f32 %v1095_v30  ;;  %v2020_v41 = vpop.f32.mrf.mxu1  ;;  %v1784_v47 = vmul.f32 -1.442695, %v1095_v30 }
 0xe63   :  { %2182 = vtanh.f32 %v1161_v38  ;;  %v2013_v42 = vpop.f32.mrf.mxu0  ;;  %v1786_v55 = vmul.f32 -1.442695, %v1161_v38 }
 0xe64   :  { %v1158_v43 = vpop.f32.mrf.mxu1  ;;  %2184 = vpow2.f32 %v1784_v47 }
 0xe65   :  { %2186 = vpow2.f32 %v1786_v55 }
 0xe66   :  { %v2021_v44 = vpop.f32.mrf.mxu1 }
 0xe6f   :  { %v2181_v45 = vpop.eup %2180 }
 0xe70   :  { %v2183_v46 = vpop.eup %2182  ;;  %1105 = vrot.lane.b32.xlu0 %v2181_v45, %s2247_s24 }
 0xe71   :  { %1171 = vrot.lane.b32.xlu1 %v2183_v46, %s2247_s24  ;;  %v2185_v48 = vpop.eup %2184 }
 0xe72   :  { %v2187_v49 = vpop.eup %2186  ;;  %v1099_v51 = vadd.f32 1.0, %v2185_v48 }
 0xe73   :  { %v1165_v56 = vadd.f32 1.0, %v2187_v49 }
 0xe74   :  { %2188 = vrcp.f32 %v1099_v51 }
 0xe75   :  { %2190 = vrcp.f32 %v1165_v56 }
 0xe81   :  { %v2189_v58 = vpop.eup %2188 }
 0xe82   :  { %v2191_v60 = vpop.eup %2190  ;;  %v1103_v63 = vmul.f32 %v2189_v58, %v2556_v9 }
 0xe83   :  { %v1169_v50 = vmul.f32 %v2191_v60, %v2560_v14 }
 0xee2   :  { %v1106_v59 = vpop.permute.xlu0 %1105 }
 0xee3   :  { %v1172_v61 = vpop.permute.xlu1 %1171  ;;  %v1108_v62 = vmul.f32 %v2189_v58, %v1106_v59 }
 0xee4   :  { %v1174_v53 = vmul.f32 %v2191_v60, %v1172_v61 }
 0xee5   :  { %1110 = vrot.lane.b32.xlu0 %v1108_v62, %s2247_s24 }
 0xee6   :  { %1176 = vrot.lane.b32.xlu1 %v1174_v53, %s2247_s24 }
 0xf57   :  { %v1111_v0 = vpop.permute.xlu0 %1110 }
 0xf58   :  { %v1177_v2 = vpop.permute.xlu1 %1176  ;;  %v2597_v4 = vadd.f32 %v1111_v0, %v1103_v63  ;;  %v2236_v63 = vld [vmem:[%s2720_s2 + $0x8] sm:$0xff]   ;;  %v2237_v0 = vld [vmem:[%s2720_s2] sm:$0xff]  }
 0xf59   :  { %v2599_v5 = vadd.f32 %v1177_v2, %v1169_v50  ;;  %v2238_v2 = vld [vmem:[%s2723_s5 + $0x8] sm:$0xff]  }
 0xf5a   :  { %2192 = vtanh.f32 %v2597_v4 }
 0xf5b   :  { %2194 = vtanh.f32 %v2599_v5 }
 0xf67   :  { %v2193_v6 = vpop.eup %2192 }
 0xf68   :  { %v2195_v7 = vpop.eup %2194  ;;  %1116 = vrot.lane.b32.xlu0 %v2193_v6, %s2247_s24  ;;  %v2241_v6 = vld [vmem:[%s2724_s4] sm:$0xff]  }
 0xf69   :  { %1182 = vrot.lane.b32.xlu1 %v2195_v7, %s2247_s24 }
 0xfda   :  { %v1117_v8 = vpop.permute.xlu0 %1116 }
 0xfdb   :  { %v1183_v9 = vpop.permute.xlu1 %1182  ;;  %v1119_v11 = vmul.f32 %v2189_v58, %v1117_v8 }
 0xfdc   :  { %v1185_v12 = vmul.f32 %v2191_v60, %v1183_v9 }
 0xfdd   :  { %v1187_v14 = vpack.c.bf16 %v1119_v11, %v1119_v11 }
 0xfde   :  { %v1186_v15 = vpack.c.bf16 %v1185_v12, %v1185_v12 }
 0xfdf   :  { %1189 = vrot.lane.b32.xlu0 %v1187_v14, %s2248_s0 }
 0xfe0   :  { %1235 = vrot.lane.b32.xlu1 %v1186_v15, %s2248_s0  ;;  %v2242_v15 = vld [vmem:[%s2722_s3] ss:$0 sm:$0xff] }
0x1051   :  { %v1190_v16 = vpop.permute.xlu0 %1189 }
0x1052   :  { %v1236_v17 = vpop.permute.xlu1 %1235  ;;  %2027 = vmatmul.mubr.msk.bf16.vlgmr.msra.gmra.mxu0 %vm167_vm3, %v1190_v16  ;;  %v132_v16 = vadd.f32 %v2242_v15, %v2421_v54  ;;  %v2107_v15 = vld [vmem:[%s2726_s7] sm:$0xff]  }
0x1053   :  { %2035 = vmatmul.mubr.msk.bf16.vlgmr.msra.gmra.mxu1 %vm167_vm3, %v1236_v17  ;;  %2039 = vmatpush3.bf16.msra.mxu0 %v2308_v3 }
0x1054   :  { %2040 = vmatprep.subr.bf16.mxu0 %v2244_v1  ;;  %2042 = vmatprep.mubr.msk.bf16.mxu0 %vm2245_vm1, %v2244_v1 }
0x1055   :  { %2047 = vmatpush3.bf16.msra.mxu1 %v2361_v34  ;;  %2050 = vmatprep.mubr.msk.bf16.mxu1 %vm2245_vm1, %v2244_v1 }
0x1056   :  { %2048 = vmatprep.subr.bf16.mxu1 %v2244_v1 }
0x1057   :  { %2041 = vmatpush3.bf16.msra.mxu0 %v2326_v10 }
0x1058   :  { %2054 = vmatprep.subr.bf16.mxu0 %v2244_v1 }
0x1059   :  { %2049 = vmatpush3.bf16.msra.mxu1 %v2373_v37 }
0x105a   :  { %2043 = vmatmul.mubr.msk.bf16.vlgmr.msra.gmra.mxu0 %vm167_vm3, %v1236_v17  ;;  %2062 = vmatprep.subr.bf16.mxu1 %v2244_v1 }
0x105b   :  { %2055 = vmatpush3.bf16.msra.mxu0 %v2366_v36  ;;  %2058 = vmatprep.mubr.msk.bf16.mxu0 %vm2245_vm1, %v2244_v1 }
0x105c   :  { %2056 = vmatprep.subr.bf16.mxu0 %v2244_v1 }
0x105f   :  { %2057 = vmatpush3.bf16.msra.mxu0 %v2384_v40 }
0x1060   :  { %2070 = vmatprep.subr.bf16.mxu0 %v2244_v1 }
0x1112   :  { %v1228_v3 = vpop.f32.mrf.mxu0 }
0x1113   :  { %v1274_v10 = vpop.f32.mrf.mxu1 }
0x1114   :  { %v1275_v34 = vadd.f32 %v1274_v10, %v1228_v3  ;;  %v2028_v18 = vpop.f32.mrf.mxu0 }
0x1115   :  { %v2036_v37 = vpop.f32.mrf.mxu1 }
0x1116   :  { %v1280_v19 = vadd.f32 %v2429_v57, %v1275_v34  ;;  %v1231_v21 = vpop.f32.mrf.mxu0 }
0x1117   :  { %v1277_v23 = vpop.f32.mrf.mxu1 }
0x1118   :  { %2196 = vtanh.f32 %v1280_v19  ;;  %v2029_v36 = vpop.f32.mrf.mxu0  ;;  %v1789_v32 = vmul.f32 -1.442695, %v1280_v19 }
0x1119   :  { %v2037_v20 = vpop.f32.mrf.mxu1 }
0x111a   :  { %v1340_v22 = vpop.f32.mrf.mxu0 }
0x111b   :  { %v1346_v27 = vadd.f32 %v1340_v22, %v129_v24 }
0x111c   :  { %v2044_v40 = vpop.f32.mrf.mxu0 }
0x111d   :  { %2198 = vtanh.f32 %v1346_v27  ;;  %v1791_v33 = vmul.f32 -1.442695, %v1346_v27 }
0x111e   :  { %v1343_v25 = vpop.f32.mrf.mxu0  ;;  %2200 = vpow2.f32 %v1789_v32 }
0x111f   :  { %2202 = vpow2.f32 %v1791_v33 }
0x1120   :  { %v2045_v28 = vpop.f32.mrf.mxu0 }
0x1125   :  { %v2197_v31 = vpop.eup %2196 }
0x1126   :  { %1290 = vrot.lane.b32.xlu0 %v2197_v31, %s2247_s24 }
0x112a   :  { %v2199_v29 = vpop.eup %2198 }
0x112b   :  { %1356 = vrot.lane.b32.xlu1 %v2199_v29, %s2247_s24  ;;  %v2201_v35 = vpop.eup %2200 }
0x112c   :  { %v1284_v30 = vadd.f32 1.0, %v2201_v35  ;;  %v2203_v13 = vpop.eup %2202 }
0x112d   :  { %v1350_v52 = vadd.f32 1.0, %v2203_v13 }
0x112e   :  { %2204 = vrcp.f32 %v1284_v30 }
0x112f   :  { %2206 = vrcp.f32 %v1350_v52 }
0x113b   :  { %v2205_v26 = vpop.eup %2204 }
0x113c   :  { %v2207_v41 = vpop.eup %2206  ;;  %v1288_v44 = vmul.f32 %v2205_v26, %v2597_v4  ;;  %v2239_v4 = vld [vmem:[%s2724_s4 + $0x8] sm:$0xff]  }
0x113d   :  { %v1354_v47 = vmul.f32 %v2207_v41, %v2599_v5  ;;  %v2240_v5 = vld [vmem:[%s2723_s5] sm:$0xff]  }
0x1198   :  { %v1291_v38 = vpop.permute.xlu0 %1290 }
0x1199   :  { %v1293_v39 = vmul.f32 %v2205_v26, %v1291_v38 }
0x119b   :  { %1295 = vrot.lane.b32.xlu0 %v1293_v39, %s2247_s24 }
0x119d   :  { %v1357_v42 = vpop.permute.xlu1 %1356 }
0x119e   :  { %v1359_v43 = vmul.f32 %v2207_v41, %v1357_v42 }
0x11a0   :  { %1361 = vrot.lane.b32.xlu1 %v1359_v43, %s2247_s24 }
0x120d   :  { %v1296_v45 = vpop.permute.xlu0 %1295 }
0x120e   :  { %v2636_v46 = vadd.f32 %v1296_v45, %v1288_v44 }
0x1210   :  { %2208 = vtanh.f32 %v2636_v46 }
0x1212   :  { %v1362_v55 = vpop.permute.xlu1 %1361 }
0x1213   :  { %v2640_v48 = vadd.f32 %v1362_v55, %v1354_v47 }
0x1215   :  { %2210 = vtanh.f32 %v2640_v48 }
0x121d   :  { %v2209_v49 = vpop.eup %2208 }
0x121e   :  { %1301 = vrot.lane.b32.xlu0 %v2209_v49, %s2247_s24 }
0x1222   :  { %v2211_v51 = vpop.eup %2210 }
0x1223   :  { %1367 = vrot.lane.b32.xlu1 %v2211_v51, %s2247_s24 }
0x1290   :  { %v1302_v56 = vpop.permute.xlu0 %1301 }
0x1291   :  { %v1304_v58 = vmul.f32 %v2205_v26, %v1302_v56 }
0x1293   :  { %v1372_v59 = vpack.c.bf16 %v1304_v58, %v1304_v58 }
0x1295   :  { %1374 = vrot.lane.b32.xlu0 %v1372_v59, %s2248_s0  ;;  %v1368_v60 = vpop.permute.xlu1 %1367 }
0x1296   :  { %v1370_v61 = vmul.f32 %v2207_v41, %v1368_v60  ;;  %v2243_v60 = vld [vmem:[%s2725_s6] ss:$0 sm:$0xff] }
0x1298   :  { %v1371_v62 = vpack.c.bf16 %v1370_v61, %v1370_v61 }
0x129a   :  { %1420 = vrot.lane.b32.xlu1 %v1371_v62, %s2248_s0 }
0x1307   :  { %v1375_v53 = vpop.permute.xlu0 %1374 }
0x1308   :  { %2051 = vmatmul.mubr.msk.bf16.vlgmr.msra.gmra.mxu1 %vm167_vm3, %v1375_v53 }
0x1309   :  { %2063 = vmatpush3.bf16.msra.mxu1 %v2236_v63  ;;  %2066 = vmatprep.mubr.msk.bf16.mxu1 %vm2245_vm1, %v2244_v1 }
0x130a   :  { %2064 = vmatprep.subr.bf16.mxu1 %v2244_v1 }
0x130c   :  { %v1421_v50 = vpop.permute.xlu1 %1420 }
0x130d   :  { %2065 = vmatpush3.bf16.msra.mxu1 %v2237_v0  ;;  %2059 = vmatmul.mubr.msk.bf16.vlgmr.msra.gmra.mxu0 %vm167_vm3, %v1421_v50 }
0x130e   :  { %2078 = vmatprep.subr.bf16.mxu1 %v2244_v1  ;;  %2071 = vmatpush3.bf16.msra.mxu0 %v2238_v2 }
0x130f   :  { %2072 = vmatprep.subr.bf16.mxu0 %v2244_v1  ;;  %2074 = vmatprep.mubr.msk.bf16.mxu0 %vm2245_vm1, %v2244_v1 }
0x1310   :  { %2067 = vmatmul.mubr.msk.bf16.vlgmr.msra.gmra.mxu1 %vm167_vm3, %v1421_v50 }
0x1311   :  { %2079 = vmatpush3.bf16.msra.mxu1 %v2239_v4  ;;  %2082 = vmatprep.mubr.msk.bf16.mxu1 %vm2245_vm1, %v2244_v1 }
0x1312   :  { %2080 = vmatprep.subr.bf16.mxu1 %v2244_v1  ;;  %2073 = vmatpush3.bf16.msra.mxu0 %v2240_v5 }
0x1313   :  { %2086 = vmatprep.subr.bf16.mxu0 %v2244_v1 }
0x1315   :  { %2081 = vmatpush3.bf16.msra.mxu1 %v2241_v6 }
0x13c8   :  { %v1413_v7 = vpop.f32.mrf.mxu1 }
0x13ca   :  { %v2052_v8 = vpop.f32.mrf.mxu1 }
0x13cc   :  { %v1416_v9 = vpop.f32.mrf.mxu1 }
0x13cd   :  { %v1459_v11 = vpop.f32.mrf.mxu0 }
0x13ce   :  { %v2053_v12 = vpop.f32.mrf.mxu1  ;;  %v1460_v14 = vadd.f32 %v1459_v11, %v1413_v7 }
0x13cf   :  { %v2060_v17 = vpop.f32.mrf.mxu0 }
0x13d0   :  { %v1465_v3 = vadd.f32 %v2429_v57, %v1460_v14  ;;  %v1525_v10 = vpop.f32.mrf.mxu1  ;;  %v2106_v14 = vld [vmem:[%s2726_s7 + $0x8] sm:$0xff]  }
0x13d1   :  { %v1531_v34 = vadd.f32 %v1525_v10, %v132_v16  ;;  %v1462_v18 = vpop.f32.mrf.mxu0 }
0x13d2   :  { %2212 = vtanh.f32 %v1465_v3  ;;  %v2068_v37 = vpop.f32.mrf.mxu1  ;;  %v1794_v20 = vmul.f32 -1.442695, %v1465_v3  ;;  %v1800_v18 = vld [vmem:[%s2727_s8] ss:$0 sm:$0xff] }
0x13d3   :  { %2214 = vtanh.f32 %v1531_v34  ;;  %v2061_v19 = vpop.f32.mrf.mxu0  ;;  %v1796_v54 = vmul.f32 -1.442695, %v1531_v34 }
0x13d4   :  { %v1528_v21 = vpop.f32.mrf.mxu1  ;;  %2216 = vpow2.f32 %v1794_v20 }
0x13d5   :  { %2218 = vpow2.f32 %v1796_v54 }
0x13d6   :  { %v2069_v23 = vpop.f32.mrf.mxu1 }
0x13df   :  { %v2213_v36 = vpop.eup %2212 }
0x13e0   :  { %v2215_v24 = vpop.eup %2214  ;;  %1475 = vrot.lane.b32.xlu0 %v2213_v36, %s2247_s24 }
0x13e1   :  { %1541 = vrot.lane.b32.xlu1 %v2215_v24, %s2247_s24  ;;  %v2217_v57 = vpop.eup %2216 }
0x13e2   :  { %v2219_v22 = vpop.eup %2218  ;;  %v1469_v27 = vadd.f32 1.0, %v2217_v57 }
0x13e3   :  { %v1535_v40 = vadd.f32 1.0, %v2219_v22 }
0x13e4   :  { %2220 = vrcp.f32 %v1469_v27 }
0x13e5   :  { %2222 = vrcp.f32 %v1535_v40 }
0x13f1   :  { %v2221_v25 = vpop.eup %2220 }
0x13f2   :  { %v2223_v31 = vpop.eup %2222  ;;  %v1473_v35 = vmul.f32 %v2221_v25, %v2636_v46 }
0x13f3   :  { %v1539_v30 = vmul.f32 %v2223_v31, %v2640_v48 }
0x1452   :  { %v1476_v28 = vpop.permute.xlu0 %1475 }
0x1453   :  { %v1542_v29 = vpop.permute.xlu1 %1541  ;;  %v1478_v32 = vmul.f32 %v2221_v25, %v1476_v28 }
0x1454   :  { %v1544_v33 = vmul.f32 %v2223_v31, %v1542_v29 }
0x1455   :  { %1480 = vrot.lane.b32.xlu0 %v1478_v32, %s2247_s24 }
0x1456   :  { %1546 = vrot.lane.b32.xlu1 %v1544_v33, %s2247_s24 }
0x14c7   :  { %v1481_v13 = vpop.permute.xlu0 %1480 }
0x14c8   :  { %v1547_v52 = vpop.permute.xlu1 %1546  ;;  %v1483_v26 = vadd.f32 %v1481_v13, %v1473_v35 }
0x14c9   :  { %v1549_v38 = vadd.f32 %v1547_v52, %v1539_v30 }
0x14ca   :  { %2224 = vtanh.f32 %v1483_v26 }
0x14cb   :  { %2226 = vtanh.f32 %v1549_v38 }
0x14d7   :  { %v2225_v39 = vpop.eup %2224 }
0x14d8   :  { %v2227_v41 = vpop.eup %2226  ;;  %1486 = vrot.lane.b32.xlu0 %v2225_v39, %s2247_s24 }
0x14d9   :  { %1552 = vrot.lane.b32.xlu1 %v2227_v41, %s2247_s24 }
0x154a   :  { %v1487_v42 = vpop.permute.xlu0 %1486 }
0x154b   :  { %v1553_v43 = vpop.permute.xlu1 %1552  ;;  %v1489_v44 = vmul.f32 %v2221_v25, %v1487_v42 }
0x154c   :  { %v1555_v45 = vmul.f32 %v2223_v31, %v1553_v43 }
0x154d   :  { %v1557_v47 = vpack.c.bf16 %v1489_v44, %v1489_v44 }
0x154e   :  { %v1556_v46 = vpack.c.bf16 %v1555_v45, %v1555_v45 }
0x154f   :  { %1559 = vrot.lane.b32.xlu0 %v1557_v47, %s2248_s0 }
0x1550   :  { %1605 = vrot.lane.b32.xlu1 %v1556_v46, %s2248_s0 }
0x15c1   :  { %v1560_v55 = vpop.permute.xlu0 %1559 }
0x15c2   :  { %v1606_v48 = vpop.permute.xlu1 %1605  ;;  %2075 = vmatmul.mubr.msk.bf16.vlgmr.msra.gmra.mxu0 %vm167_vm3, %v1560_v55 }
0x15c3   :  { %2083 = vmatmul.mubr.msk.bf16.vlgmr.msra.gmra.mxu1 %vm167_vm3, %v1606_v48  ;;  %2090 = vmatprep.mubr.msk.bf16.mxu0 %vm2245_vm1, %v2244_v1 }
0x15c4   :  { %2087 = vmatpush3.bf16.msra.mxu0 %v2106_v14 }
0x15c5   :  { %2088 = vmatprep.subr.bf16.mxu0 %v2244_v1 }
0x15c8   :  { %2089 = vmatpush3.bf16.msra.mxu0 %v2107_v15 }
0x1682   :  { %v1598_v49 = vpop.f32.mrf.mxu0 }
0x1683   :  { %v1644_v51 = vpop.f32.mrf.mxu1 }
0x1684   :  { %v1645_v56 = vadd.f32 %v1644_v51, %v1598_v49  ;;  %v2076_v58 = vpop.f32.mrf.mxu0 }
0x1685   :  { %v2084_v59 = vpop.f32.mrf.mxu1 }
0x1686   :  { %v1650_v61 = vadd.f32 %v2243_v60, %v1645_v56  ;;  %v1601_v62 = vpop.f32.mrf.mxu0 }
0x1687   :  { %v1647_v53 = vpop.f32.mrf.mxu1 }
0x1688   :  { %2228 = vtanh.f32 %v1650_v61  ;;  %v2077_v63 = vpop.f32.mrf.mxu0  ;;  %v1799_v2 = vmul.f32 -1.442695, %v1650_v61 }
0x1689   :  { %v2085_v50 = vpop.f32.mrf.mxu1 }
0x168a   :  { %2230 = vpow2.f32 %v1799_v2 }
0x1695   :  { %v2229_v0 = vpop.eup %2228 }
0x1696   :  { %1660 = vrot.lane.b32.xlu0 %v2229_v0, %s2247_s24 }
0x1697   :  { %v2231_v4 = vpop.eup %2230 }
0x1698   :  { %v1654_v5 = vadd.f32 1.0, %v2231_v4 }
0x169a   :  { %2232 = vrcp.f32 %v1654_v5 }
0x16a7   :  { %v2233_v6 = vpop.eup %2232 }
0x16a8   :  { %v1658_v9 = vmul.f32 %v2233_v6, %v1483_v26 }
0x1708   :  { %v1661_v7 = vpop.permute.xlu0 %1660 }
0x1709   :  { %v1663_v8 = vmul.f32 %v2233_v6, %v1661_v7 }
0x170b   :  { %1665 = vrot.lane.b32.xlu1 %v1663_v8, %s2247_s24 }
0x177d   :  { %v1666_v11 = vpop.permute.xlu1 %1665 }
0x177e   :  { %v1668_v12 = vadd.f32 %v1666_v11, %v1658_v9 }
0x1780   :  { %2234 = vtanh.f32 %v1668_v12 }
0x178d   :  { %v2235_v16 = vpop.eup %2234 }
0x178e   :  { %1671 = vrot.lane.b32.xlu0 %v2235_v16, %s2247_s24 }
0x1800   :  { %v1672_v17 = vpop.permute.xlu0 %1671 }
0x1801   :  { %v1674_v3 = vmul.f32 %v2233_v6, %v1672_v17 }
0x1803   :  { %v1675_v10 = vpack.c.bf16 %v1674_v3, %v1674_v3 }
0x1805   :  { %1688 = vrot.lane.b32.xlu1 %v1675_v10, %s2248_s0 }
0x1877   :  { %v1689_v34 = vpop.permute.xlu1 %1688 }
0x1878   :  { %2091 = vmatmul.mubr.msk.bf16.vlgmr.msra.gmra.mxu0 %vm167_vm3, %v1689_v34 }
0x1938   :  { %v1739_v37 = vpop.f32.mrf.mxu0 }
0x1939   :  { %v1740_v19 = vadd.f32 %v1800_v18, %v1739_v37 }
0x193a   :  { %v2092_v21 = vpop.f32.mrf.mxu0 }
0x193b   :  { %1745 = vst [vmem:[%s2728_s9] sm:$0xff] %v1740_v19 }
0x193c   :  { %v1742_v1 = vpop.f32.mrf.mxu0 }
0x193e   :  { %v2093_v23 = vpop.f32.mrf.mxu0 }

</bundles_post_ra>
